<compile_context>
chip_gen: v6e
topology: v6e:2x2x1
jax: 0.10.0
libtpu: 0.0.40
codegen_flags: <defaults>
</compile_context>

<pallas_src>
from functools import partial

import jax
import jax.numpy as jnp
from jax.experimental import pallas as pl
from jax.experimental.pallas import tpu as pltpu


def _izhikevich_kernel(x_ref, c_ref, d_ref, v_in_ref, u_in_ref,
                       v_out_ref, u_out_ref, fired_ref, v_trace_ref,
                       *, a, b, threshold):
    tc = pl.program_id(1)               # time chunk (arbitrary / sequential)
    t_chunk = x_ref.shape[0]            # static sub-steps folded into this call

    # Load the initial state into the VMEM-resident output blocks at the first
    # time chunk; they stay resident across the whole timestep sweep.
    @pl.when(tc == 0)
    def _():
        v_out_ref[...] = v_in_ref[...]
        u_out_ref[...] = u_in_ref[...]

    c = c_ref[...]
    d = d_ref[...]
    v = v_out_ref[...]
    u = u_out_ref[...]
    fired = v >= threshold

    # Static (trace-time) unroll over the time sub-steps of this chunk;
    # the wrapper keeps t_chunk <= 32 so compile time stays cheap.
    for t in range(t_chunk):
        inp = x_ref[t]                  # x + 3.0 * randn, pre-added in wrapper

        # self.is_firing = self.v >= self.threshold ; reset fired neurons.
        fired = v >= threshold
        v = jnp.where(fired, c, v)
        u = jnp.where(fired, u + d, u)
        # TODO(synk): PyTorch's host-side `assert self.v <= self.threshold` has
        # no in-kernel equivalent (pl.debug_check under enable_debug_checks
        # could recover it for test builds); omitted here.

        # Two Euler half-steps with the step-invariant part hoisted:
        #   v += 0.5*(0.04 v^2 + 5 v + 140 - u + inp)
        #     == v += 0.02 v^2 + 2.5 v + k,   k = 0.5*(inp - u) + 70
        k = 0.5 * (inp - u) + 70.0
        v = v + (0.02 * v * v + 2.5 * v + k)
        v = v + (0.02 * v * v + 2.5 * v + k)
        # Recovery-variable update.
        u = u + a * (b * v - u)

        v_trace_ref[t] = v.astype(v_trace_ref.dtype)   # per-step membrane trace

    v_out_ref[...] = v
    u_out_ref[...] = u

    # Only the last step's firing mask is consumed; store it once, on the
    # final time chunk (saves the cast + store on every other step).
    @pl.when(tc == pl.num_programs(1) - 1)
    def _():
        fired_ref[...] = fired.astype(jnp.float32)


def _pick_block_rows(rows):
    """Largest multiple-of-8 divisor of `rows`, capped at 256 rows, keeping at
    least 2 parallel row blocks (when possible) so v7x's two TCs both run."""
    cap = min(256, rows if rows < 16 else rows // 2)
    best = 8
    br = 16
    while br <= cap:
        if rows % br == 0:
            best = br
        br += 8
    return best


def _pick_t_chunk(T, block_rows):
    """Timesteps folded per grid step: keep each (t_chunk, block_rows, 128) f32
    tile around <= 2 MiB, the static unroll <= 32, and divide T exactly."""
    bytes_per_step = block_rows * 128 * 4
    cap = max(1, min(T, 32, (2 << 20) // bytes_per_step))
    t_chunk = cap
    while T % t_chunk != 0:
        t_chunk -= 1
    return t_chunk


@partial(jax.jit, static_argnames=("a", "b", "threshold", "trace_dtype"))
def izhikevich_simulate(key, x_seq, c, d, v0, u0, *,
                        a=0.02, b=0.2, threshold=30.0, trace_dtype=jnp.float32):
    """Run T Izhikevich steps for a population laid out as (rows, 128) tiles.

    key: jax PRNG key; x_seq: (T, rows, 128) f32; c, d, v0, u0: (rows, 128) f32.
    Returns (v, u, fired, v_trace); v/u are aliased in place onto v0/u0.
    """
    T, rows, lanes = x_seq.shape
    assert lanes == 128 and rows % 8 == 0 and T >= 1

    # inp = x + 3.0 * randn(x.size())  -- exact torch.randn semantics, generated
    # under the same jit so the Pallas body stays pure VPU arithmetic.
    inp_seq = x_seq + 3.0 * jax.random.normal(key, x_seq.shape, x_seq.dtype)

    block_rows = _pick_block_rows(rows)
    t_chunk = _pick_t_chunk(T, block_rows)
    n_blocks = rows // block_rows
    n_chunks = T // t_chunk

    state_spec = pl.BlockSpec((block_rows, 128), lambda i, tc: (i, 0))
    seq_spec = pl.BlockSpec((t_chunk, block_rows, 128), lambda i, tc: (tc, i, 0))

    kernel = partial(_izhikevich_kernel, a=float(a), b=float(b),
                     threshold=float(threshold))

    return pl.pallas_call(
        kernel,
        grid=(n_blocks, n_chunks),
        in_specs=[
            seq_spec,     # inp_seq (x + noise)
            state_spec,   # c
            state_spec,   # d
            state_spec,   # v0
            state_spec,   # u0
        ],
        out_specs=(state_spec, state_spec, state_spec, seq_spec),
        out_shape=(
            jax.ShapeDtypeStruct((rows, 128), jnp.float32),      # v (final)
            jax.ShapeDtypeStruct((rows, 128), jnp.float32),      # u (final)
            jax.ShapeDtypeStruct((rows, 128), jnp.float32),      # fired (last step)
            jax.ShapeDtypeStruct((T, rows, 128), trace_dtype),   # v trace per step
        ),
        input_output_aliases={3: 0, 4: 1},   # v0 -> v, u0 -> u (in-place state)
        compiler_params=pltpu.CompilerParams(
            dimension_semantics=("parallel", "arbitrary")),
    )(inp_seq, c, d, v0, u0)


class NodePopulation:
    """JAX/Pallas port of spiking/node.py::Node, batched over N neurons."""

    def __init__(self, pos, neighbours_dist, neighbourhood_size, key, n_neurons):
        assert n_neurons % 1024 == 0, "pad N to a multiple of 8*128"
        self.rows = n_neurons // 128
        nd = jnp.asarray(neighbours_dist, jnp.float32)
        neighbours_excitory = (nd < neighbourhood_size[0]).astype(jnp.float32)
        neighbours_inhibitory = (nd > neighbourhood_size[1]).astype(jnp.float32)
        # Weights are unused in forward() (as in the original module); kept for fidelity.
        self.weights = (neighbours_excitory * 5.0
                        + neighbours_inhibitory * jnp.exp(-nd / 10.0) * -2.0)
        k1, k2 = jax.random.split(key)
        self.a = 0.02
        self.b = 0.2
        self.threshold = 30.0
        self.c = -65.0 + 15.0 * jax.random.uniform(k1, (self.rows, 128), jnp.float32) ** 2
        self.d = 8.0 - 6.0 * jax.random.uniform(k2, (self.rows, 128), jnp.float32) ** 2
        self.pos = pos
        self.v = jnp.full((self.rows, 128), -65.0, jnp.float32)
        self.u = self.b * self.v
        self.is_firing = jnp.zeros((self.rows, 128), dtype=jnp.bool_)

    def get_weights(self):
        return self.weights

    def get_pos(self):
        return self.pos

    def is_node_firing(self):
        return self.is_firing

    def forward(self, x_seq, key):
        # State stays device-resident (no bool()/float() host syncs); the
        # original per-step `self.v.item()` becomes a per-step v trace array.
        v, u, fired, v_trace = izhikevich_simulate(
            key, x_seq, self.c, self.d, self.v, self.u,
            a=self.a, b=self.b, threshold=self.threshold)
        self.v, self.u = v, u
        self.is_firing = fired > 0.5
        return v_trace

    def reset(self):
        self.v = jnp.full((self.rows, 128), -65.0, jnp.float32)
        self.u = self.b * self.v
        self.is_firing = jnp.zeros((self.rows, 128), dtype=jnp.bool_)


if __name__ == "__main__":
    key = jax.random.PRNGKey(0)
    k_param, k_x, k_dist, k_noise = jax.random.split(key, 4)

    N = 2048    # neurons -> (16, 128) lane-dense tiles, 2 parallel row blocks
    T = 16      # on-device timesteps folded into one kernel launch

    neighbours_dist = jax.random.uniform(k_dist, (N, 8), jnp.float32) * 4.0
    pop = NodePopulation(pos=(0.0, 0.0),
                         neighbours_dist=neighbours_dist,
                         neighbourhood_size=(1.0, 2.5),
                         key=k_param,
                         n_neurons=N)

    # Per-timestep, per-neuron input currents (the `x` of Node.forward).
    x_seq = 5.0 * jax.random.normal(k_x, (T, N // 128, 128), jnp.float32)

    v_trace = pop.forward(x_seq, k_noise)
    jax.block_until_ready((pop.v, pop.u, v_trace))
    assert v_trace.shape == (T, N // 128, 128)
    assert jnp.isfinite(pop.v).all() and jnp.isfinite(pop.u).all()
    assert jnp.isfinite(v_trace).all()
    print("KERNEL_OK")
</pallas_src>

<mosaic_0001>
module attributes {stable_mosaic.version = 11 : i64} {
  func.func @_izhikevich_kernel(%arg0: i32, %arg1: i32, %arg2: memref<16x8x128xf32, #tpu.memory_space<vmem>>, %arg3: memref<8x128xf32, #tpu.memory_space<vmem>>, %arg4: memref<8x128xf32, #tpu.memory_space<vmem>>, %arg5: memref<8x128xf32, #tpu.memory_space<vmem>>, %arg6: memref<8x128xf32, #tpu.memory_space<vmem>>, %arg7: memref<8x128xf32, #tpu.memory_space<vmem>>, %arg8: memref<8x128xf32, #tpu.memory_space<vmem>>, %arg9: memref<8x128xf32, #tpu.memory_space<vmem>>, %arg10: memref<16x8x128xf32, #tpu.memory_space<vmem>>) attributes {dimension_semantics = [#tpu.dimension_semantics<parallel>, #tpu.dimension_semantics<arbitrary>], iteration_bounds = array<i64: 2, 1>, scalar_prefetch = 0 : i64, scratch_operands = 0 : i64, tpu.core_type = #tpu.core_type<tc>, window_params = [{transform_indices = @transform_0, window_bounds = array<i64: 16, 8, 128>}, {transform_indices = @transform_1, window_bounds = array<i64: 8, 128>}, {transform_indices = @transform_2, window_bounds = array<i64: 8, 128>}, {transform_indices = @transform_3, window_bounds = array<i64: 8, 128>}, {transform_indices = @transform_4, window_bounds = array<i64: 8, 128>}, {transform_indices = @transform_5, window_bounds = array<i64: 8, 128>}, {transform_indices = @transform_6, window_bounds = array<i64: 8, 128>}, {transform_indices = @transform_7, window_bounds = array<i64: 8, 128>}, {transform_indices = @transform_8, window_bounds = array<i64: 16, 8, 128>}]} {
    %c0_i32 = arith.constant 0 : i32
    %0 = arith.cmpi eq, %arg1, %c0_i32 : i32
    %1 = arith.extui %0 : i1 to i32
    %c0_i32_0 = arith.constant 0 : i32
    %2 = arith.cmpi ne, %1, %c0_i32_0 : i32
    scf.if %2 {
      %c0_238 = arith.constant 0 : index
      %c0_239 = arith.constant 0 : index
      %604 = vector.load %arg5[%c0_238, %c0_239] : memref<8x128xf32, #tpu.memory_space<vmem>>, vector<8x128xf32>
      %c0_240 = arith.constant 0 : index
      %c0_241 = arith.constant 0 : index
      %605 = vector.load %arg7[%c0_240, %c0_241] : memref<8x128xf32, #tpu.memory_space<vmem>>, vector<8x128xf32>
      tpu.vector_store %arg7[%c0_240, %c0_241], %604 {strides = array<i32>} : memref<8x128xf32, #tpu.memory_space<vmem>>, vector<8x128xf32>,
      %c0_242 = arith.constant 0 : index
      %c0_243 = arith.constant 0 : index
      %606 = vector.load %arg6[%c0_242, %c0_243] : memref<8x128xf32, #tpu.memory_space<vmem>>, vector<8x128xf32>
      %c0_244 = arith.constant 0 : index
      %c0_245 = arith.constant 0 : index
      %607 = vector.load %arg8[%c0_244, %c0_245] : memref<8x128xf32, #tpu.memory_space<vmem>>, vector<8x128xf32>
      tpu.vector_store %arg8[%c0_244, %c0_245], %606 {strides = array<i32>} : memref<8x128xf32, #tpu.memory_space<vmem>>, vector<8x128xf32>,
    } else {
    }
    %c0 = arith.constant 0 : index
    %c0_1 = arith.constant 0 : index
    %3 = vector.load %arg3[%c0, %c0_1] : memref<8x128xf32, #tpu.memory_space<vmem>>, vector<8x128xf32>
    %c0_2 = arith.constant 0 : index
    %c0_3 = arith.constant 0 : index
    %4 = vector.load %arg4[%c0_2, %c0_3] : memref<8x128xf32, #tpu.memory_space<vmem>>, vector<8x128xf32>
    %c0_4 = arith.constant 0 : index
    %c0_5 = arith.constant 0 : index
    %5 = vector.load %arg7[%c0_4, %c0_5] : memref<8x128xf32, #tpu.memory_space<vmem>>, vector<8x128xf32>
    %c0_6 = arith.constant 0 : index
    %c0_7 = arith.constant 0 : index
    %6 = vector.load %arg8[%c0_6, %c0_7] : memref<8x128xf32, #tpu.memory_space<vmem>>, vector<8x128xf32>
    %c0_8 = arith.constant 0 : index
    %c0_9 = arith.constant 0 : index
    %c0_10 = arith.constant 0 : index
    %7 = vector.load %arg2[%c0_8, %c0_9, %c0_10] : memref<16x8x128xf32, #tpu.memory_space<vmem>>, vector<1x8x128xf32>
    %8 = vector.shape_cast %7 : vector<1x8x128xf32> to vector<8x128xf32>
    %cst = arith.constant 3.000000e+01 : f32
    %9 = vector.broadcast %cst : f32 to vector<8x128xf32>
    %10 = arith.cmpf oge, %5, %9 : vector<8x128xf32>
    %11 = arith.select %10, %3, %5 : vector<8x128xi1>, vector<8x128xf32>
    %12 = arith.addf %6, %4 : vector<8x128xf32>
    %13 = arith.select %10, %12, %6 : vector<8x128xi1>, vector<8x128xf32>
    %14 = arith.subf %8, %13 : vector<8x128xf32>
    %cst_11 = arith.constant 5.000000e-01 : f32
    %15 = vector.broadcast %cst_11 : f32 to vector<8x128xf32>
    %16 = arith.mulf %15, %14 : vector<8x128xf32>
    %cst_12 = arith.constant 7.000000e+01 : f32
    %17 = vector.broadcast %cst_12 : f32 to vector<8x128xf32>
    %18 = arith.addf %16, %17 : vector<8x128xf32>
    %cst_13 = arith.constant 2.000000e-02 : f32
    %19 = vector.broadcast %cst_13 : f32 to vector<8x128xf32>
    %20 = arith.mulf %19, %11 : vector<8x128xf32>
    %21 = arith.mulf %20, %11 : vector<8x128xf32>
    %cst_14 = arith.constant 2.500000e+00 : f32
    %22 = vector.broadcast %cst_14 : f32 to vector<8x128xf32>
    %23 = arith.mulf %22, %11 : vector<8x128xf32>
    %24 = arith.addf %21, %23 : vector<8x128xf32>
    %25 = arith.addf %24, %18 : vector<8x128xf32>
    %26 = arith.addf %11, %25 : vector<8x128xf32>
    %cst_15 = arith.constant 2.000000e-02 : f32
    %27 = vector.broadcast %cst_15 : f32 to vector<8x128xf32>
    %28 = arith.mulf %27, %26 : vector<8x128xf32>
    %29 = arith.mulf %28, %26 : vector<8x128xf32>
    %cst_16 = arith.constant 2.500000e+00 : f32
    %30 = vector.broadcast %cst_16 : f32 to vector<8x128xf32>
    %31 = arith.mulf %30, %26 : vector<8x128xf32>
    %32 = arith.addf %29, %31 : vector<8x128xf32>
    %33 = arith.addf %32, %18 : vector<8x128xf32>
    %34 = arith.addf %26, %33 : vector<8x128xf32>
    %cst_17 = arith.constant 2.000000e-01 : f32
    %35 = vector.broadcast %cst_17 : f32 to vector<8x128xf32>
    %36 = arith.mulf %35, %34 : vector<8x128xf32>
    %37 = arith.subf %36, %13 : vector<8x128xf32>
    %cst_18 = arith.constant 2.000000e-02 : f32
    %38 = vector.broadcast %cst_18 : f32 to vector<8x128xf32>
    %39 = arith.mulf %38, %37 : vector<8x128xf32>
    %40 = arith.addf %13, %39 : vector<8x128xf32>
    %c0_19 = arith.constant 0 : index
    %c0_20 = arith.constant 0 : index
    %c0_21 = arith.constant 0 : index
    %41 = vector.load %arg10[%c0_19, %c0_20, %c0_21] : memref<16x8x128xf32, #tpu.memory_space<vmem>>, vector<1x8x128xf32>
    %42 = vector.shape_cast %41 : vector<1x8x128xf32> to vector<8x128xf32>
    %43 = vector.shape_cast %34 : vector<8x128xf32> to vector<1x8x128xf32>
    tpu.vector_store %arg10[%c0_19, %c0_20, %c0_21], %43 {strides = array<i32>} : memref<16x8x128xf32, #tpu.memory_space<vmem>>, vector<1x8x128xf32>,
    %c1 = arith.constant 1 : index
    %c0_22 = arith.constant 0 : index
    %c0_23 = arith.constant 0 : index
    %44 = vector.load %arg2[%c1, %c0_22, %c0_23] : memref<16x8x128xf32, #tpu.memory_space<vmem>>, vector<1x8x128xf32>
    %45 = vector.shape_cast %44 : vector<1x8x128xf32> to vector<8x128xf32>
    %cst_24 = arith.constant 3.000000e+01 : f32
    %46 = vector.broadcast %cst_24 : f32 to vector<8x128xf32>
    %47 = arith.cmpf oge, %34, %46 : vector<8x128xf32>
    %48 = arith.select %47, %3, %34 : vector<8x128xi1>, vector<8x128xf32>
    %49 = arith.addf %40, %4 : vector<8x128xf32>
    %50 = arith.select %47, %49, %40 : vector<8x128xi1>, vector<8x128xf32>
    %51 = arith.subf %45, %50 : vector<8x128xf32>
    %cst_25 = arith.constant 5.000000e-01 : f32
    %52 = vector.broadcast %cst_25 : f32 to vector<8x128xf32>
    %53 = arith.mulf %52, %51 : vector<8x128xf32>
    %cst_26 = arith.constant 7.000000e+01 : f32
    %54 = vector.broadcast %cst_26 : f32 to vector<8x128xf32>
    %55 = arith.addf %53, %54 : vector<8x128xf32>
    %cst_27 = arith.constant 2.000000e-02 : f32
    %56 = vector.broadcast %cst_27 : f32 to vector<8x128xf32>
    %57 = arith.mulf %56, %48 : vector<8x128xf32>
    %58 = arith.mulf %57, %48 : vector<8x128xf32>
    %cst_28 = arith.constant 2.500000e+00 : f32
    %59 = vector.broadcast %cst_28 : f32 to vector<8x128xf32>
    %60 = arith.mulf %59, %48 : vector<8x128xf32>
    %61 = arith.addf %58, %60 : vector<8x128xf32>
    %62 = arith.addf %61, %55 : vector<8x128xf32>
    %63 = arith.addf %48, %62 : vector<8x128xf32>
    %cst_29 = arith.constant 2.000000e-02 : f32
    %64 = vector.broadcast %cst_29 : f32 to vector<8x128xf32>
    %65 = arith.mulf %64, %63 : vector<8x128xf32>
    %66 = arith.mulf %65, %63 : vector<8x128xf32>
    %cst_30 = arith.constant 2.500000e+00 : f32
    %67 = vector.broadcast %cst_30 : f32 to vector<8x128xf32>
    %68 = arith.mulf %67, %63 : vector<8x128xf32>
    %69 = arith.addf %66, %68 : vector<8x128xf32>
    %70 = arith.addf %69, %55 : vector<8x128xf32>
    %71 = arith.addf %63, %70 : vector<8x128xf32>
    %cst_31 = arith.constant 2.000000e-01 : f32
    %72 = vector.broadcast %cst_31 : f32 to vector<8x128xf32>
    %73 = arith.mulf %72, %71 : vector<8x128xf32>
    %74 = arith.subf %73, %50 : vector<8x128xf32>
    %cst_32 = arith.constant 2.000000e-02 : f32
    %75 = vector.broadcast %cst_32 : f32 to vector<8x128xf32>
    %76 = arith.mulf %75, %74 : vector<8x128xf32>
    %77 = arith.addf %50, %76 : vector<8x128xf32>
    %c1_33 = arith.constant 1 : index
    %c0_34 = arith.constant 0 : index
    %c0_35 = arith.constant 0 : index
    %78 = vector.load %arg10[%c1_33, %c0_34, %c0_35] : memref<16x8x128xf32, #tpu.memory_space<vmem>>, vector<1x8x128xf32>
    %79 = vector.shape_cast %78 : vector<1x8x128xf32> to vector<8x128xf32>
    %80 = vector.shape_cast %71 : vector<8x128xf32> to vector<1x8x128xf32>
    tpu.vector_store %arg10[%c1_33, %c0_34, %c0_35], %80 {strides = array<i32>} : memref<16x8x128xf32, #tpu.memory_space<vmem>>, vector<1x8x128xf32>,
    %c2 = arith.constant 2 : index
    %c0_36 = arith.constant 0 : index
    %c0_37 = arith.constant 0 : index
    %81 = vector.load %arg2[%c2, %c0_36, %c0_37] : memref<16x8x128xf32, #tpu.memory_space<vmem>>, vector<1x8x128xf32>
    %82 = vector.shape_cast %81 : vector<1x8x128xf32> to vector<8x128xf32>
    %cst_38 = arith.constant 3.000000e+01 : f32
    %83 = vector.broadcast %cst_38 : f32 to vector<8x128xf32>
    %84 = arith.cmpf oge, %71, %83 : vector<8x128xf32>
    %85 = arith.select %84, %3, %71 : vector<8x128xi1>, vector<8x128xf32>
    %86 = arith.addf %77, %4 : vector<8x128xf32>
    %87 = arith.select %84, %86, %77 : vector<8x128xi1>, vector<8x128xf32>
    %88 = arith.subf %82, %87 : vector<8x128xf32>
    %cst_39 = arith.constant 5.000000e-01 : f32
    %89 = vector.broadcast %cst_39 : f32 to vector<8x128xf32>
    %90 = arith.mulf %89, %88 : vector<8x128xf32>
    %cst_40 = arith.constant 7.000000e+01 : f32
    %91 = vector.broadcast %cst_40 : f32 to vector<8x128xf32>
    %92 = arith.addf %90, %91 : vector<8x128xf32>
    %cst_41 = arith.constant 2.000000e-02 : f32
    %93 = vector.broadcast %cst_41 : f32 to vector<8x128xf32>
    %94 = arith.mulf %93, %85 : vector<8x128xf32>
    %95 = arith.mulf %94, %85 : vector<8x128xf32>
    %cst_42 = arith.constant 2.500000e+00 : f32
    %96 = vector.broadcast %cst_42 : f32 to vector<8x128xf32>
    %97 = arith.mulf %96, %85 : vector<8x128xf32>
    %98 = arith.addf %95, %97 : vector<8x128xf32>
    %99 = arith.addf %98, %92 : vector<8x128xf32>
    %100 = arith.addf %85, %99 : vector<8x128xf32>
    %cst_43 = arith.constant 2.000000e-02 : f32
    %101 = vector.broadcast %cst_43 : f32 to vector<8x128xf32>
    %102 = arith.mulf %101, %100 : vector<8x128xf32>
    %103 = arith.mulf %102, %100 : vector<8x128xf32>
    %cst_44 = arith.constant 2.500000e+00 : f32
    %104 = vector.broadcast %cst_44 : f32 to vector<8x128xf32>
    %105 = arith.mulf %104, %100 : vector<8x128xf32>
    %106 = arith.addf %103, %105 : vector<8x128xf32>
    %107 = arith.addf %106, %92 : vector<8x128xf32>
    %108 = arith.addf %100, %107 : vector<8x128xf32>
    %cst_45 = arith.constant 2.000000e-01 : f32
    %109 = vector.broadcast %cst_45 : f32 to vector<8x128xf32>
    %110 = arith.mulf %109, %108 : vector<8x128xf32>
    %111 = arith.subf %110, %87 : vector<8x128xf32>
    %cst_46 = arith.constant 2.000000e-02 : f32
    %112 = vector.broadcast %cst_46 : f32 to vector<8x128xf32>
    %113 = arith.mulf %112, %111 : vector<8x128xf32>
    %114 = arith.addf %87, %113 : vector<8x128xf32>
    %c2_47 = arith.constant 2 : index
    %c0_48 = arith.constant 0 : index
    %c0_49 = arith.constant 0 : index
    %115 = vector.load %arg10[%c2_47, %c0_48, %c0_49] : memref<16x8x128xf32, #tpu.memory_space<vmem>>, vector<1x8x128xf32>
    %116 = vector.shape_cast %115 : vector<1x8x128xf32> to vector<8x128xf32>
    %117 = vector.shape_cast %108 : vector<8x128xf32> to vector<1x8x128xf32>
    tpu.vector_store %arg10[%c2_47, %c0_48, %c0_49], %117 {strides = array<i32>} : memref<16x8x128xf32, #tpu.memory_space<vmem>>, vector<1x8x128xf32>,
    %c3 = arith.constant 3 : index
    %c0_50 = arith.constant 0 : index
    %c0_51 = arith.constant 0 : index
    %118 = vector.load %arg2[%c3, %c0_50, %c0_51] : memref<16x8x128xf32, #tpu.memory_space<vmem>>, vector<1x8x128xf32>
    %119 = vector.shape_cast %118 : vector<1x8x128xf32> to vector<8x128xf32>
    %cst_52 = arith.constant 3.000000e+01 : f32
    %120 = vector.broadcast %cst_52 : f32 to vector<8x128xf32>
    %121 = arith.cmpf oge, %108, %120 : vector<8x128xf32>
    %122 = arith.select %121, %3, %108 : vector<8x128xi1>, vector<8x128xf32>
    %123 = arith.addf %114, %4 : vector<8x128xf32>
    %124 = arith.select %121, %123, %114 : vector<8x128xi1>, vector<8x128xf32>
    %125 = arith.subf %119, %124 : vector<8x128xf32>
    %cst_53 = arith.constant 5.000000e-01 : f32
    %126 = vector.broadcast %cst_53 : f32 to vector<8x128xf32>
    %127 = arith.mulf %126, %125 : vector<8x128xf32>
    %cst_54 = arith.constant 7.000000e+01 : f32
    %128 = vector.broadcast %cst_54 : f32 to vector<8x128xf32>
    %129 = arith.addf %127, %128 : vector<8x128xf32>
    %cst_55 = arith.constant 2.000000e-02 : f32
    %130 = vector.broadcast %cst_55 : f32 to vector<8x128xf32>
    %131 = arith.mulf %130, %122 : vector<8x128xf32>
    %132 = arith.mulf %131, %122 : vector<8x128xf32>
    %cst_56 = arith.constant 2.500000e+00 : f32
    %133 = vector.broadcast %cst_56 : f32 to vector<8x128xf32>
    %134 = arith.mulf %133, %122 : vector<8x128xf32>
    %135 = arith.addf %132, %134 : vector<8x128xf32>
    %136 = arith.addf %135, %129 : vector<8x128xf32>
    %137 = arith.addf %122, %136 : vector<8x128xf32>
    %cst_57 = arith.constant 2.000000e-02 : f32
    %138 = vector.broadcast %cst_57 : f32 to vector<8x128xf32>
    %139 = arith.mulf %138, %137 : vector<8x128xf32>
    %140 = arith.mulf %139, %137 : vector<8x128xf32>
    %cst_58 = arith.constant 2.500000e+00 : f32
    %141 = vector.broadcast %cst_58 : f32 to vector<8x128xf32>
    %142 = arith.mulf %141, %137 : vector<8x128xf32>
    %143 = arith.addf %140, %142 : vector<8x128xf32>
    %144 = arith.addf %143, %129 : vector<8x128xf32>
    %145 = arith.addf %137, %144 : vector<8x128xf32>
    %cst_59 = arith.constant 2.000000e-01 : f32
    %146 = vector.broadcast %cst_59 : f32 to vector<8x128xf32>
    %147 = arith.mulf %146, %145 : vector<8x128xf32>
    %148 = arith.subf %147, %124 : vector<8x128xf32>
    %cst_60 = arith.constant 2.000000e-02 : f32
    %149 = vector.broadcast %cst_60 : f32 to vector<8x128xf32>
    %150 = arith.mulf %149, %148 : vector<8x128xf32>
    %151 = arith.addf %124, %150 : vector<8x128xf32>
    %c3_61 = arith.constant 3 : index
    %c0_62 = arith.constant 0 : index
    %c0_63 = arith.constant 0 : index
    %152 = vector.load %arg10[%c3_61, %c0_62, %c0_63] : memref<16x8x128xf32, #tpu.memory_space<vmem>>, vector<1x8x128xf32>
    %153 = vector.shape_cast %152 : vector<1x8x128xf32> to vector<8x128xf32>
    %154 = vector.shape_cast %145 : vector<8x128xf32> to vector<1x8x128xf32>
    tpu.vector_store %arg10[%c3_61, %c0_62, %c0_63], %154 {strides = array<i32>} : memref<16x8x128xf32, #tpu.memory_space<vmem>>, vector<1x8x128xf32>,
    %c4 = arith.constant 4 : index
    %c0_64 = arith.constant 0 : index
    %c0_65 = arith.constant 0 : index
    %155 = vector.load %arg2[%c4, %c0_64, %c0_65] : memref<16x8x128xf32, #tpu.memory_space<vmem>>, vector<1x8x128xf32>
    %156 = vector.shape_cast %155 : vector<1x8x128xf32> to vector<8x128xf32>
    %cst_66 = arith.constant 3.000000e+01 : f32
    %157 = vector.broadcast %cst_66 : f32 to vector<8x128xf32>
    %158 = arith.cmpf oge, %145, %157 : vector<8x128xf32>
    %159 = arith.select %158, %3, %145 : vector<8x128xi1>, vector<8x128xf32>
    %160 = arith.addf %151, %4 : vector<8x128xf32>
    %161 = arith.select %158, %160, %151 : vector<8x128xi1>, vector<8x128xf32>
    %162 = arith.subf %156, %161 : vector<8x128xf32>
    %cst_67 = arith.constant 5.000000e-01 : f32
    %163 = vector.broadcast %cst_67 : f32 to vector<8x128xf32>
    %164 = arith.mulf %163, %162 : vector<8x128xf32>
    %cst_68 = arith.constant 7.000000e+01 : f32
    %165 = vector.broadcast %cst_68 : f32 to vector<8x128xf32>
    %166 = arith.addf %164, %165 : vector<8x128xf32>
    %cst_69 = arith.constant 2.000000e-02 : f32
    %167 = vector.broadcast %cst_69 : f32 to vector<8x128xf32>
    %168 = arith.mulf %167, %159 : vector<8x128xf32>
    %169 = arith.mulf %168, %159 : vector<8x128xf32>
    %cst_70 = arith.constant 2.500000e+00 : f32
    %170 = vector.broadcast %cst_70 : f32 to vector<8x128xf32>
    %171 = arith.mulf %170, %159 : vector<8x128xf32>
    %172 = arith.addf %169, %171 : vector<8x128xf32>
    %173 = arith.addf %172, %166 : vector<8x128xf32>
    %174 = arith.addf %159, %173 : vector<8x128xf32>
    %cst_71 = arith.constant 2.000000e-02 : f32
    %175 = vector.broadcast %cst_71 : f32 to vector<8x128xf32>
    %176 = arith.mulf %175, %174 : vector<8x128xf32>
    %177 = arith.mulf %176, %174 : vector<8x128xf32>
    %cst_72 = arith.constant 2.500000e+00 : f32
    %178 = vector.broadcast %cst_72 : f32 to vector<8x128xf32>
    %179 = arith.mulf %178, %174 : vector<8x128xf32>
    %180 = arith.addf %177, %179 : vector<8x128xf32>
    %181 = arith.addf %180, %166 : vector<8x128xf32>
    %182 = arith.addf %174, %181 : vector<8x128xf32>
    %cst_73 = arith.constant 2.000000e-01 : f32
    %183 = vector.broadcast %cst_73 : f32 to vector<8x128xf32>
    %184 = arith.mulf %183, %182 : vector<8x128xf32>
    %185 = arith.subf %184, %161 : vector<8x128xf32>
    %cst_74 = arith.constant 2.000000e-02 : f32
    %186 = vector.broadcast %cst_74 : f32 to vector<8x128xf32>
    %187 = arith.mulf %186, %185 : vector<8x128xf32>
    %188 = arith.addf %161, %187 : vector<8x128xf32>
    %c4_75 = arith.constant 4 : index
    %c0_76 = arith.constant 0 : index
    %c0_77 = arith.constant 0 : index
    %189 = vector.load %arg10[%c4_75, %c0_76, %c0_77] : memref<16x8x128xf32, #tpu.memory_space<vmem>>, vector<1x8x128xf32>
    %190 = vector.shape_cast %189 : vector<1x8x128xf32> to vector<8x128xf32>
    %191 = vector.shape_cast %182 : vector<8x128xf32> to vector<1x8x128xf32>
    tpu.vector_store %arg10[%c4_75, %c0_76, %c0_77], %191 {strides = array<i32>} : memref<16x8x128xf32, #tpu.memory_space<vmem>>, vector<1x8x128xf32>,
    %c5 = arith.constant 5 : index
    %c0_78 = arith.constant 0 : index
    %c0_79 = arith.constant 0 : index
    %192 = vector.load %arg2[%c5, %c0_78, %c0_79] : memref<16x8x128xf32, #tpu.memory_space<vmem>>, vector<1x8x128xf32>
    %193 = vector.shape_cast %192 : vector<1x8x128xf32> to vector<8x128xf32>
    %cst_80 = arith.constant 3.000000e+01 : f32
    %194 = vector.broadcast %cst_80 : f32 to vector<8x128xf32>
    %195 = arith.cmpf oge, %182, %194 : vector<8x128xf32>
    %196 = arith.select %195, %3, %182 : vector<8x128xi1>, vector<8x128xf32>
    %197 = arith.addf %188, %4 : vector<8x128xf32>
    %198 = arith.select %195, %197, %188 : vector<8x128xi1>, vector<8x128xf32>
    %199 = arith.subf %193, %198 : vector<8x128xf32>
    %cst_81 = arith.constant 5.000000e-01 : f32
    %200 = vector.broadcast %cst_81 : f32 to vector<8x128xf32>
    %201 = arith.mulf %200, %199 : vector<8x128xf32>
    %cst_82 = arith.constant 7.000000e+01 : f32
    %202 = vector.broadcast %cst_82 : f32 to vector<8x128xf32>
    %203 = arith.addf %201, %202 : vector<8x128xf32>
    %cst_83 = arith.constant 2.000000e-02 : f32
    %204 = vector.broadcast %cst_83 : f32 to vector<8x128xf32>
    %205 = arith.mulf %204, %196 : vector<8x128xf32>
    %206 = arith.mulf %205, %196 : vector<8x128xf32>
    %cst_84 = arith.constant 2.500000e+00 : f32
    %207 = vector.broadcast %cst_84 : f32 to vector<8x128xf32>
    %208 = arith.mulf %207, %196 : vector<8x128xf32>
    %209 = arith.addf %206, %208 : vector<8x128xf32>
    %210 = arith.addf %209, %203 : vector<8x128xf32>
    %211 = arith.addf %196, %210 : vector<8x128xf32>
    %cst_85 = arith.constant 2.000000e-02 : f32
    %212 = vector.broadcast %cst_85 : f32 to vector<8x128xf32>
    %213 = arith.mulf %212, %211 : vector<8x128xf32>
    %214 = arith.mulf %213, %211 : vector<8x128xf32>
    %cst_86 = arith.constant 2.500000e+00 : f32
    %215 = vector.broadcast %cst_86 : f32 to vector<8x128xf32>
    %216 = arith.mulf %215, %211 : vector<8x128xf32>
    %217 = arith.addf %214, %216 : vector<8x128xf32>
    %218 = arith.addf %217, %203 : vector<8x128xf32>
    %219 = arith.addf %211, %218 : vector<8x128xf32>
    %cst_87 = arith.constant 2.000000e-01 : f32
    %220 = vector.broadcast %cst_87 : f32 to vector<8x128xf32>
    %221 = arith.mulf %220, %219 : vector<8x128xf32>
    %222 = arith.subf %221, %198 : vector<8x128xf32>
    %cst_88 = arith.constant 2.000000e-02 : f32
    %223 = vector.broadcast %cst_88 : f32 to vector<8x128xf32>
    %224 = arith.mulf %223, %222 : vector<8x128xf32>
    %225 = arith.addf %198, %224 : vector<8x128xf32>
    %c5_89 = arith.constant 5 : index
    %c0_90 = arith.constant 0 : index
    %c0_91 = arith.constant 0 : index
    %226 = vector.load %arg10[%c5_89, %c0_90, %c0_91] : memref<16x8x128xf32, #tpu.memory_space<vmem>>, vector<1x8x128xf32>
    %227 = vector.shape_cast %226 : vector<1x8x128xf32> to vector<8x128xf32>
    %228 = vector.shape_cast %219 : vector<8x128xf32> to vector<1x8x128xf32>
    tpu.vector_store %arg10[%c5_89, %c0_90, %c0_91], %228 {strides = array<i32>} : memref<16x8x128xf32, #tpu.memory_space<vmem>>, vector<1x8x128xf32>,
    %c6 = arith.constant 6 : index
    %c0_92 = arith.constant 0 : index
    %c0_93 = arith.constant 0 : index
    %229 = vector.load %arg2[%c6, %c0_92, %c0_93] : memref<16x8x128xf32, #tpu.memory_space<vmem>>, vector<1x8x128xf32>
    %230 = vector.shape_cast %229 : vector<1x8x128xf32> to vector<8x128xf32>
    %cst_94 = arith.constant 3.000000e+01 : f32
    %231 = vector.broadcast %cst_94 : f32 to vector<8x128xf32>
    %232 = arith.cmpf oge, %219, %231 : vector<8x128xf32>
    %233 = arith.select %232, %3, %219 : vector<8x128xi1>, vector<8x128xf32>
    %234 = arith.addf %225, %4 : vector<8x128xf32>
    %235 = arith.select %232, %234, %225 : vector<8x128xi1>, vector<8x128xf32>
    %236 = arith.subf %230, %235 : vector<8x128xf32>
    %cst_95 = arith.constant 5.000000e-01 : f32
    %237 = vector.broadcast %cst_95 : f32 to vector<8x128xf32>
    %238 = arith.mulf %237, %236 : vector<8x128xf32>
    %cst_96 = arith.constant 7.000000e+01 : f32
    %239 = vector.broadcast %cst_96 : f32 to vector<8x128xf32>
    %240 = arith.addf %238, %239 : vector<8x128xf32>
    %cst_97 = arith.constant 2.000000e-02 : f32
    %241 = vector.broadcast %cst_97 : f32 to vector<8x128xf32>
    %242 = arith.mulf %241, %233 : vector<8x128xf32>
    %243 = arith.mulf %242, %233 : vector<8x128xf32>
    %cst_98 = arith.constant 2.500000e+00 : f32
    %244 = vector.broadcast %cst_98 : f32 to vector<8x128xf32>
    %245 = arith.mulf %244, %233 : vector<8x128xf32>
    %246 = arith.addf %243, %245 : vector<8x128xf32>
    %247 = arith.addf %246, %240 : vector<8x128xf32>
    %248 = arith.addf %233, %247 : vector<8x128xf32>
    %cst_99 = arith.constant 2.000000e-02 : f32
    %249 = vector.broadcast %cst_99 : f32 to vector<8x128xf32>
    %250 = arith.mulf %249, %248 : vector<8x128xf32>
    %251 = arith.mulf %250, %248 : vector<8x128xf32>
    %cst_100 = arith.constant 2.500000e+00 : f32
    %252 = vector.broadcast %cst_100 : f32 to vector<8x128xf32>
    %253 = arith.mulf %252, %248 : vector<8x128xf32>
    %254 = arith.addf %251, %253 : vector<8x128xf32>
    %255 = arith.addf %254, %240 : vector<8x128xf32>
    %256 = arith.addf %248, %255 : vector<8x128xf32>
    %cst_101 = arith.constant 2.000000e-01 : f32
    %257 = vector.broadcast %cst_101 : f32 to vector<8x128xf32>
    %258 = arith.mulf %257, %256 : vector<8x128xf32>
    %259 = arith.subf %258, %235 : vector<8x128xf32>
    %cst_102 = arith.constant 2.000000e-02 : f32
    %260 = vector.broadcast %cst_102 : f32 to vector<8x128xf32>
    %261 = arith.mulf %260, %259 : vector<8x128xf32>
    %262 = arith.addf %235, %261 : vector<8x128xf32>
    %c6_103 = arith.constant 6 : index
    %c0_104 = arith.constant 0 : index
    %c0_105 = arith.constant 0 : index
    %263 = vector.load %arg10[%c6_103, %c0_104, %c0_105] : memref<16x8x128xf32, #tpu.memory_space<vmem>>, vector<1x8x128xf32>
    %264 = vector.shape_cast %263 : vector<1x8x128xf32> to vector<8x128xf32>
    %265 = vector.shape_cast %256 : vector<8x128xf32> to vector<1x8x128xf32>
    tpu.vector_store %arg10[%c6_103, %c0_104, %c0_105], %265 {strides = array<i32>} : memref<16x8x128xf32, #tpu.memory_space<vmem>>, vector<1x8x128xf32>,
    %c7 = arith.constant 7 : index
    %c0_106 = arith.constant 0 : index
    %c0_107 = arith.constant 0 : index
    %266 = vector.load %arg2[%c7, %c0_106, %c0_107] : memref<16x8x128xf32, #tpu.memory_space<vmem>>, vector<1x8x128xf32>
    %267 = vector.shape_cast %266 : vector<1x8x128xf32> to vector<8x128xf32>
    %cst_108 = arith.constant 3.000000e+01 : f32
    %268 = vector.broadcast %cst_108 : f32 to vector<8x128xf32>
    %269 = arith.cmpf oge, %256, %268 : vector<8x128xf32>
    %270 = arith.select %269, %3, %256 : vector<8x128xi1>, vector<8x128xf32>
    %271 = arith.addf %262, %4 : vector<8x128xf32>
    %272 = arith.select %269, %271, %262 : vector<8x128xi1>, vector<8x128xf32>
    %273 = arith.subf %267, %272 : vector<8x128xf32>
    %cst_109 = arith.constant 5.000000e-01 : f32
    %274 = vector.broadcast %cst_109 : f32 to vector<8x128xf32>
    %275 = arith.mulf %274, %273 : vector<8x128xf32>
    %cst_110 = arith.constant 7.000000e+01 : f32
    %276 = vector.broadcast %cst_110 : f32 to vector<8x128xf32>
    %277 = arith.addf %275, %276 : vector<8x128xf32>
    %cst_111 = arith.constant 2.000000e-02 : f32
    %278 = vector.broadcast %cst_111 : f32 to vector<8x128xf32>
    %279 = arith.mulf %278, %270 : vector<8x128xf32>
    %280 = arith.mulf %279, %270 : vector<8x128xf32>
    %cst_112 = arith.constant 2.500000e+00 : f32
    %281 = vector.broadcast %cst_112 : f32 to vector<8x128xf32>
    %282 = arith.mulf %281, %270 : vector<8x128xf32>
    %283 = arith.addf %280, %282 : vector<8x128xf32>
    %284 = arith.addf %283, %277 : vector<8x128xf32>
    %285 = arith.addf %270, %284 : vector<8x128xf32>
    %cst_113 = arith.constant 2.000000e-02 : f32
    %286 = vector.broadcast %cst_113 : f32 to vector<8x128xf32>
    %287 = arith.mulf %286, %285 : vector<8x128xf32>
    %288 = arith.mulf %287, %285 : vector<8x128xf32>
    %cst_114 = arith.constant 2.500000e+00 : f32
    %289 = vector.broadcast %cst_114 : f32 to vector<8x128xf32>
    %290 = arith.mulf %289, %285 : vector<8x128xf32>
    %291 = arith.addf %288, %290 : vector<8x128xf32>
    %292 = arith.addf %291, %277 : vector<8x128xf32>
    %293 = arith.addf %285, %292 : vector<8x128xf32>
    %cst_115 = arith.constant 2.000000e-01 : f32
    %294 = vector.broadcast %cst_115 : f32 to vector<8x128xf32>
    %295 = arith.mulf %294, %293 : vector<8x128xf32>
    %296 = arith.subf %295, %272 : vector<8x128xf32>
    %cst_116 = arith.constant 2.000000e-02 : f32
    %297 = vector.broadcast %cst_116 : f32 to vector<8x128xf32>
    %298 = arith.mulf %297, %296 : vector<8x128xf32>
    %299 = arith.addf %272, %298 : vector<8x128xf32>
    %c7_117 = arith.constant 7 : index
    %c0_118 = arith.constant 0 : index
    %c0_119 = arith.constant 0 : index
    %300 = vector.load %arg10[%c7_117, %c0_118, %c0_119] : memref<16x8x128xf32, #tpu.memory_space<vmem>>, vector<1x8x128xf32>
    %301 = vector.shape_cast %300 : vector<1x8x128xf32> to vector<8x128xf32>
    %302 = vector.shape_cast %293 : vector<8x128xf32> to vector<1x8x128xf32>
    tpu.vector_store %arg10[%c7_117, %c0_118, %c0_119], %302 {strides = array<i32>} : memref<16x8x128xf32, #tpu.memory_space<vmem>>, vector<1x8x128xf32>,
    %c8 = arith.constant 8 : index
    %c0_120 = arith.constant 0 : index
    %c0_121 = arith.constant 0 : index
    %303 = vector.load %arg2[%c8, %c0_120, %c0_121] : memref<16x8x128xf32, #tpu.memory_space<vmem>>, vector<1x8x128xf32>
    %304 = vector.shape_cast %303 : vector<1x8x128xf32> to vector<8x128xf32>
    %cst_122 = arith.constant 3.000000e+01 : f32
    %305 = vector.broadcast %cst_122 : f32 to vector<8x128xf32>
    %306 = arith.cmpf oge, %293, %305 : vector<8x128xf32>
    %307 = arith.select %306, %3, %293 : vector<8x128xi1>, vector<8x128xf32>
    %308 = arith.addf %299, %4 : vector<8x128xf32>
    %309 = arith.select %306, %308, %299 : vector<8x128xi1>, vector<8x128xf32>
    %310 = arith.subf %304, %309 : vector<8x128xf32>
    %cst_123 = arith.constant 5.000000e-01 : f32
    %311 = vector.broadcast %cst_123 : f32 to vector<8x128xf32>
    %312 = arith.mulf %311, %310 : vector<8x128xf32>
    %cst_124 = arith.constant 7.000000e+01 : f32
    %313 = vector.broadcast %cst_124 : f32 to vector<8x128xf32>
    %314 = arith.addf %312, %313 : vector<8x128xf32>
    %cst_125 = arith.constant 2.000000e-02 : f32
    %315 = vector.broadcast %cst_125 : f32 to vector<8x128xf32>
    %316 = arith.mulf %315, %307 : vector<8x128xf32>
    %317 = arith.mulf %316, %307 : vector<8x128xf32>
    %cst_126 = arith.constant 2.500000e+00 : f32
    %318 = vector.broadcast %cst_126 : f32 to vector<8x128xf32>
    %319 = arith.mulf %318, %307 : vector<8x128xf32>
    %320 = arith.addf %317, %319 : vector<8x128xf32>
    %321 = arith.addf %320, %314 : vector<8x128xf32>
    %322 = arith.addf %307, %321 : vector<8x128xf32>
    %cst_127 = arith.constant 2.000000e-02 : f32
    %323 = vector.broadcast %cst_127 : f32 to vector<8x128xf32>
    %324 = arith.mulf %323, %322 : vector<8x128xf32>
    %325 = arith.mulf %324, %322 : vector<8x128xf32>
    %cst_128 = arith.constant 2.500000e+00 : f32
    %326 = vector.broadcast %cst_128 : f32 to vector<8x128xf32>
    %327 = arith.mulf %326, %322 : vector<8x128xf32>
    %328 = arith.addf %325, %327 : vector<8x128xf32>
    %329 = arith.addf %328, %314 : vector<8x128xf32>
    %330 = arith.addf %322, %329 : vector<8x128xf32>
    %cst_129 = arith.constant 2.000000e-01 : f32
    %331 = vector.broadcast %cst_129 : f32 to vector<8x128xf32>
    %332 = arith.mulf %331, %330 : vector<8x128xf32>
    %333 = arith.subf %332, %309 : vector<8x128xf32>
    %cst_130 = arith.constant 2.000000e-02 : f32
    %334 = vector.broadcast %cst_130 : f32 to vector<8x128xf32>
    %335 = arith.mulf %334, %333 : vector<8x128xf32>
    %336 = arith.addf %309, %335 : vector<8x128xf32>
    %c8_131 = arith.constant 8 : index
    %c0_132 = arith.constant 0 : index
    %c0_133 = arith.constant 0 : index
    %337 = vector.load %arg10[%c8_131, %c0_132, %c0_133] : memref<16x8x128xf32, #tpu.memory_space<vmem>>, vector<1x8x128xf32>
    %338 = vector.shape_cast %337 : vector<1x8x128xf32> to vector<8x128xf32>
    %339 = vector.shape_cast %330 : vector<8x128xf32> to vector<1x8x128xf32>
    tpu.vector_store %arg10[%c8_131, %c0_132, %c0_133], %339 {strides = array<i32>} : memref<16x8x128xf32, #tpu.memory_space<vmem>>, vector<1x8x128xf32>,
    %c9 = arith.constant 9 : index
    %c0_134 = arith.constant 0 : index
    %c0_135 = arith.constant 0 : index
    %340 = vector.load %arg2[%c9, %c0_134, %c0_135] : memref<16x8x128xf32, #tpu.memory_space<vmem>>, vector<1x8x128xf32>
    %341 = vector.shape_cast %340 : vector<1x8x128xf32> to vector<8x128xf32>
    %cst_136 = arith.constant 3.000000e+01 : f32
    %342 = vector.broadcast %cst_136 : f32 to vector<8x128xf32>
    %343 = arith.cmpf oge, %330, %342 : vector<8x128xf32>
    %344 = arith.select %343, %3, %330 : vector<8x128xi1>, vector<8x128xf32>
    %345 = arith.addf %336, %4 : vector<8x128xf32>
    %346 = arith.select %343, %345, %336 : vector<8x128xi1>, vector<8x128xf32>
    %347 = arith.subf %341, %346 : vector<8x128xf32>
    %cst_137 = arith.constant 5.000000e-01 : f32
    %348 = vector.broadcast %cst_137 : f32 to vector<8x128xf32>
    %349 = arith.mulf %348, %347 : vector<8x128xf32>
    %cst_138 = arith.constant 7.000000e+01 : f32
    %350 = vector.broadcast %cst_138 : f32 to vector<8x128xf32>
    %351 = arith.addf %349, %350 : vector<8x128xf32>
    %cst_139 = arith.constant 2.000000e-02 : f32
    %352 = vector.broadcast %cst_139 : f32 to vector<8x128xf32>
    %353 = arith.mulf %352, %344 : vector<8x128xf32>
    %354 = arith.mulf %353, %344 : vector<8x128xf32>
    %cst_140 = arith.constant 2.500000e+00 : f32
    %355 = vector.broadcast %cst_140 : f32 to vector<8x128xf32>
    %356 = arith.mulf %355, %344 : vector<8x128xf32>
    %357 = arith.addf %354, %356 : vector<8x128xf32>
    %358 = arith.addf %357, %351 : vector<8x128xf32>
    %359 = arith.addf %344, %358 : vector<8x128xf32>
    %cst_141 = arith.constant 2.000000e-02 : f32
    %360 = vector.broadcast %cst_141 : f32 to vector<8x128xf32>
    %361 = arith.mulf %360, %359 : vector<8x128xf32>
    %362 = arith.mulf %361, %359 : vector<8x128xf32>
    %cst_142 = arith.constant 2.500000e+00 : f32
    %363 = vector.broadcast %cst_142 : f32 to vector<8x128xf32>
    %364 = arith.mulf %363, %359 : vector<8x128xf32>
    %365 = arith.addf %362, %364 : vector<8x128xf32>
    %366 = arith.addf %365, %351 : vector<8x128xf32>
    %367 = arith.addf %359, %366 : vector<8x128xf32>
    %cst_143 = arith.constant 2.000000e-01 : f32
    %368 = vector.broadcast %cst_143 : f32 to vector<8x128xf32>
    %369 = arith.mulf %368, %367 : vector<8x128xf32>
    %370 = arith.subf %369, %346 : vector<8x128xf32>
    %cst_144 = arith.constant 2.000000e-02 : f32
    %371 = vector.broadcast %cst_144 : f32 to vector<8x128xf32>
    %372 = arith.mulf %371, %370 : vector<8x128xf32>
    %373 = arith.addf %346, %372 : vector<8x128xf32>
    %c9_145 = arith.constant 9 : index
    %c0_146 = arith.constant 0 : index
    %c0_147 = arith.constant 0 : index
    %374 = vector.load %arg10[%c9_145, %c0_146, %c0_147] : memref<16x8x128xf32, #tpu.memory_space<vmem>>, vector<1x8x128xf32>
    %375 = vector.shape_cast %374 : vector<1x8x128xf32> to vector<8x128xf32>
    %376 = vector.shape_cast %367 : vector<8x128xf32> to vector<1x8x128xf32>
    tpu.vector_store %arg10[%c9_145, %c0_146, %c0_147], %376 {strides = array<i32>} : memref<16x8x128xf32, #tpu.memory_space<vmem>>, vector<1x8x128xf32>,
    %c10 = arith.constant 10 : index
    %c0_148 = arith.constant 0 : index
    %c0_149 = arith.constant 0 : index
    %377 = vector.load %arg2[%c10, %c0_148, %c0_149] : memref<16x8x128xf32, #tpu.memory_space<vmem>>, vector<1x8x128xf32>
    %378 = vector.shape_cast %377 : vector<1x8x128xf32> to vector<8x128xf32>
    %cst_150 = arith.constant 3.000000e+01 : f32
    %379 = vector.broadcast %cst_150 : f32 to vector<8x128xf32>
    %380 = arith.cmpf oge, %367, %379 : vector<8x128xf32>
    %381 = arith.select %380, %3, %367 : vector<8x128xi1>, vector<8x128xf32>
    %382 = arith.addf %373, %4 : vector<8x128xf32>
    %383 = arith.select %380, %382, %373 : vector<8x128xi1>, vector<8x128xf32>
    %384 = arith.subf %378, %383 : vector<8x128xf32>
    %cst_151 = arith.constant 5.000000e-01 : f32
    %385 = vector.broadcast %cst_151 : f32 to vector<8x128xf32>
    %386 = arith.mulf %385, %384 : vector<8x128xf32>
    %cst_152 = arith.constant 7.000000e+01 : f32
    %387 = vector.broadcast %cst_152 : f32 to vector<8x128xf32>
    %388 = arith.addf %386, %387 : vector<8x128xf32>
    %cst_153 = arith.constant 2.000000e-02 : f32
    %389 = vector.broadcast %cst_153 : f32 to vector<8x128xf32>
    %390 = arith.mulf %389, %381 : vector<8x128xf32>
    %391 = arith.mulf %390, %381 : vector<8x128xf32>
    %cst_154 = arith.constant 2.500000e+00 : f32
    %392 = vector.broadcast %cst_154 : f32 to vector<8x128xf32>
    %393 = arith.mulf %392, %381 : vector<8x128xf32>
    %394 = arith.addf %391, %393 : vector<8x128xf32>
    %395 = arith.addf %394, %388 : vector<8x128xf32>
    %396 = arith.addf %381, %395 : vector<8x128xf32>
    %cst_155 = arith.constant 2.000000e-02 : f32
    %397 = vector.broadcast %cst_155 : f32 to vector<8x128xf32>
    %398 = arith.mulf %397, %396 : vector<8x128xf32>
    %399 = arith.mulf %398, %396 : vector<8x128xf32>
    %cst_156 = arith.constant 2.500000e+00 : f32
    %400 = vector.broadcast %cst_156 : f32 to vector<8x128xf32>
    %401 = arith.mulf %400, %396 : vector<8x128xf32>
    %402 = arith.addf %399, %401 : vector<8x128xf32>
    %403 = arith.addf %402, %388 : vector<8x128xf32>
    %404 = arith.addf %396, %403 : vector<8x128xf32>
    %cst_157 = arith.constant 2.000000e-01 : f32
    %405 = vector.broadcast %cst_157 : f32 to vector<8x128xf32>
    %406 = arith.mulf %405, %404 : vector<8x128xf32>
    %407 = arith.subf %406, %383 : vector<8x128xf32>
    %cst_158 = arith.constant 2.000000e-02 : f32
    %408 = vector.broadcast %cst_158 : f32 to vector<8x128xf32>
    %409 = arith.mulf %408, %407 : vector<8x128xf32>
    %410 = arith.addf %383, %409 : vector<8x128xf32>
    %c10_159 = arith.constant 10 : index
    %c0_160 = arith.constant 0 : index
    %c0_161 = arith.constant 0 : index
    %411 = vector.load %arg10[%c10_159, %c0_160, %c0_161] : memref<16x8x128xf32, #tpu.memory_space<vmem>>, vector<1x8x128xf32>
    %412 = vector.shape_cast %411 : vector<1x8x128xf32> to vector<8x128xf32>
    %413 = vector.shape_cast %404 : vector<8x128xf32> to vector<1x8x128xf32>
    tpu.vector_store %arg10[%c10_159, %c0_160, %c0_161], %413 {strides = array<i32>} : memref<16x8x128xf32, #tpu.memory_space<vmem>>, vector<1x8x128xf32>,
    %c11 = arith.constant 11 : index
    %c0_162 = arith.constant 0 : index
    %c0_163 = arith.constant 0 : index
    %414 = vector.load %arg2[%c11, %c0_162, %c0_163] : memref<16x8x128xf32, #tpu.memory_space<vmem>>, vector<1x8x128xf32>
    %415 = vector.shape_cast %414 : vector<1x8x128xf32> to vector<8x128xf32>
    %cst_164 = arith.constant 3.000000e+01 : f32
    %416 = vector.broadcast %cst_164 : f32 to vector<8x128xf32>
    %417 = arith.cmpf oge, %404, %416 : vector<8x128xf32>
    %418 = arith.select %417, %3, %404 : vector<8x128xi1>, vector<8x128xf32>
    %419 = arith.addf %410, %4 : vector<8x128xf32>
    %420 = arith.select %417, %419, %410 : vector<8x128xi1>, vector<8x128xf32>
    %421 = arith.subf %415, %420 : vector<8x128xf32>
    %cst_165 = arith.constant 5.000000e-01 : f32
    %422 = vector.broadcast %cst_165 : f32 to vector<8x128xf32>
    %423 = arith.mulf %422, %421 : vector<8x128xf32>
    %cst_166 = arith.constant 7.000000e+01 : f32
    %424 = vector.broadcast %cst_166 : f32 to vector<8x128xf32>
    %425 = arith.addf %423, %424 : vector<8x128xf32>
    %cst_167 = arith.constant 2.000000e-02 : f32
    %426 = vector.broadcast %cst_167 : f32 to vector<8x128xf32>
    %427 = arith.mulf %426, %418 : vector<8x128xf32>
    %428 = arith.mulf %427, %418 : vector<8x128xf32>
    %cst_168 = arith.constant 2.500000e+00 : f32
    %429 = vector.broadcast %cst_168 : f32 to vector<8x128xf32>
    %430 = arith.mulf %429, %418 : vector<8x128xf32>
    %431 = arith.addf %428, %430 : vector<8x128xf32>
    %432 = arith.addf %431, %425 : vector<8x128xf32>
    %433 = arith.addf %418, %432 : vector<8x128xf32>
    %cst_169 = arith.constant 2.000000e-02 : f32
    %434 = vector.broadcast %cst_169 : f32 to vector<8x128xf32>
    %435 = arith.mulf %434, %433 : vector<8x128xf32>
    %436 = arith.mulf %435, %433 : vector<8x128xf32>
    %cst_170 = arith.constant 2.500000e+00 : f32
    %437 = vector.broadcast %cst_170 : f32 to vector<8x128xf32>
    %438 = arith.mulf %437, %433 : vector<8x128xf32>
    %439 = arith.addf %436, %438 : vector<8x128xf32>
    %440 = arith.addf %439, %425 : vector<8x128xf32>
    %441 = arith.addf %433, %440 : vector<8x128xf32>
    %cst_171 = arith.constant 2.000000e-01 : f32
    %442 = vector.broadcast %cst_171 : f32 to vector<8x128xf32>
    %443 = arith.mulf %442, %441 : vector<8x128xf32>
    %444 = arith.subf %443, %420 : vector<8x128xf32>
    %cst_172 = arith.constant 2.000000e-02 : f32
    %445 = vector.broadcast %cst_172 : f32 to vector<8x128xf32>
    %446 = arith.mulf %445, %444 : vector<8x128xf32>
    %447 = arith.addf %420, %446 : vector<8x128xf32>
    %c11_173 = arith.constant 11 : index
    %c0_174 = arith.constant 0 : index
    %c0_175 = arith.constant 0 : index
    %448 = vector.load %arg10[%c11_173, %c0_174, %c0_175] : memref<16x8x128xf32, #tpu.memory_space<vmem>>, vector<1x8x128xf32>
    %449 = vector.shape_cast %448 : vector<1x8x128xf32> to vector<8x128xf32>
    %450 = vector.shape_cast %441 : vector<8x128xf32> to vector<1x8x128xf32>
    tpu.vector_store %arg10[%c11_173, %c0_174, %c0_175], %450 {strides = array<i32>} : memref<16x8x128xf32, #tpu.memory_space<vmem>>, vector<1x8x128xf32>,
    %c12 = arith.constant 12 : index
    %c0_176 = arith.constant 0 : index
    %c0_177 = arith.constant 0 : index
    %451 = vector.load %arg2[%c12, %c0_176, %c0_177] : memref<16x8x128xf32, #tpu.memory_space<vmem>>, vector<1x8x128xf32>
    %452 = vector.shape_cast %451 : vector<1x8x128xf32> to vector<8x128xf32>
    %cst_178 = arith.constant 3.000000e+01 : f32
    %453 = vector.broadcast %cst_178 : f32 to vector<8x128xf32>
    %454 = arith.cmpf oge, %441, %453 : vector<8x128xf32>
    %455 = arith.select %454, %3, %441 : vector<8x128xi1>, vector<8x128xf32>
    %456 = arith.addf %447, %4 : vector<8x128xf32>
    %457 = arith.select %454, %456, %447 : vector<8x128xi1>, vector<8x128xf32>
    %458 = arith.subf %452, %457 : vector<8x128xf32>
    %cst_179 = arith.constant 5.000000e-01 : f32
    %459 = vector.broadcast %cst_179 : f32 to vector<8x128xf32>
    %460 = arith.mulf %459, %458 : vector<8x128xf32>
    %cst_180 = arith.constant 7.000000e+01 : f32
    %461 = vector.broadcast %cst_180 : f32 to vector<8x128xf32>
    %462 = arith.addf %460, %461 : vector<8x128xf32>
    %cst_181 = arith.constant 2.000000e-02 : f32
    %463 = vector.broadcast %cst_181 : f32 to vector<8x128xf32>
    %464 = arith.mulf %463, %455 : vector<8x128xf32>
    %465 = arith.mulf %464, %455 : vector<8x128xf32>
    %cst_182 = arith.constant 2.500000e+00 : f32
    %466 = vector.broadcast %cst_182 : f32 to vector<8x128xf32>
    %467 = arith.mulf %466, %455 : vector<8x128xf32>
    %468 = arith.addf %465, %467 : vector<8x128xf32>
    %469 = arith.addf %468, %462 : vector<8x128xf32>
    %470 = arith.addf %455, %469 : vector<8x128xf32>
    %cst_183 = arith.constant 2.000000e-02 : f32
    %471 = vector.broadcast %cst_183 : f32 to vector<8x128xf32>
    %472 = arith.mulf %471, %470 : vector<8x128xf32>
    %473 = arith.mulf %472, %470 : vector<8x128xf32>
    %cst_184 = arith.constant 2.500000e+00 : f32
    %474 = vector.broadcast %cst_184 : f32 to vector<8x128xf32>
    %475 = arith.mulf %474, %470 : vector<8x128xf32>
    %476 = arith.addf %473, %475 : vector<8x128xf32>
    %477 = arith.addf %476, %462 : vector<8x128xf32>
    %478 = arith.addf %470, %477 : vector<8x128xf32>
    %cst_185 = arith.constant 2.000000e-01 : f32
    %479 = vector.broadcast %cst_185 : f32 to vector<8x128xf32>
    %480 = arith.mulf %479, %478 : vector<8x128xf32>
    %481 = arith.subf %480, %457 : vector<8x128xf32>
    %cst_186 = arith.constant 2.000000e-02 : f32
    %482 = vector.broadcast %cst_186 : f32 to vector<8x128xf32>
    %483 = arith.mulf %482, %481 : vector<8x128xf32>
    %484 = arith.addf %457, %483 : vector<8x128xf32>
    %c12_187 = arith.constant 12 : index
    %c0_188 = arith.constant 0 : index
    %c0_189 = arith.constant 0 : index
    %485 = vector.load %arg10[%c12_187, %c0_188, %c0_189] : memref<16x8x128xf32, #tpu.memory_space<vmem>>, vector<1x8x128xf32>
    %486 = vector.shape_cast %485 : vector<1x8x128xf32> to vector<8x128xf32>
    %487 = vector.shape_cast %478 : vector<8x128xf32> to vector<1x8x128xf32>
    tpu.vector_store %arg10[%c12_187, %c0_188, %c0_189], %487 {strides = array<i32>} : memref<16x8x128xf32, #tpu.memory_space<vmem>>, vector<1x8x128xf32>,
    %c13 = arith.constant 13 : index
    %c0_190 = arith.constant 0 : index
    %c0_191 = arith.constant 0 : index
    %488 = vector.load %arg2[%c13, %c0_190, %c0_191] : memref<16x8x128xf32, #tpu.memory_space<vmem>>, vector<1x8x128xf32>
    %489 = vector.shape_cast %488 : vector<1x8x128xf32> to vector<8x128xf32>
    %cst_192 = arith.constant 3.000000e+01 : f32
    %490 = vector.broadcast %cst_192 : f32 to vector<8x128xf32>
    %491 = arith.cmpf oge, %478, %490 : vector<8x128xf32>
    %492 = arith.select %491, %3, %478 : vector<8x128xi1>, vector<8x128xf32>
    %493 = arith.addf %484, %4 : vector<8x128xf32>
    %494 = arith.select %491, %493, %484 : vector<8x128xi1>, vector<8x128xf32>
    %495 = arith.subf %489, %494 : vector<8x128xf32>
    %cst_193 = arith.constant 5.000000e-01 : f32
    %496 = vector.broadcast %cst_193 : f32 to vector<8x128xf32>
    %497 = arith.mulf %496, %495 : vector<8x128xf32>
    %cst_194 = arith.constant 7.000000e+01 : f32
    %498 = vector.broadcast %cst_194 : f32 to vector<8x128xf32>
    %499 = arith.addf %497, %498 : vector<8x128xf32>
    %cst_195 = arith.constant 2.000000e-02 : f32
    %500 = vector.broadcast %cst_195 : f32 to vector<8x128xf32>
    %501 = arith.mulf %500, %492 : vector<8x128xf32>
    %502 = arith.mulf %501, %492 : vector<8x128xf32>
    %cst_196 = arith.constant 2.500000e+00 : f32
    %503 = vector.broadcast %cst_196 : f32 to vector<8x128xf32>
    %504 = arith.mulf %503, %492 : vector<8x128xf32>
    %505 = arith.addf %502, %504 : vector<8x128xf32>
    %506 = arith.addf %505, %499 : vector<8x128xf32>
    %507 = arith.addf %492, %506 : vector<8x128xf32>
    %cst_197 = arith.constant 2.000000e-02 : f32
    %508 = vector.broadcast %cst_197 : f32 to vector<8x128xf32>
    %509 = arith.mulf %508, %507 : vector<8x128xf32>
    %510 = arith.mulf %509, %507 : vector<8x128xf32>
    %cst_198 = arith.constant 2.500000e+00 : f32
    %511 = vector.broadcast %cst_198 : f32 to vector<8x128xf32>
    %512 = arith.mulf %511, %507 : vector<8x128xf32>
    %513 = arith.addf %510, %512 : vector<8x128xf32>
    %514 = arith.addf %513, %499 : vector<8x128xf32>
    %515 = arith.addf %507, %514 : vector<8x128xf32>
    %cst_199 = arith.constant 2.000000e-01 : f32
    %516 = vector.broadcast %cst_199 : f32 to vector<8x128xf32>
    %517 = arith.mulf %516, %515 : vector<8x128xf32>
    %518 = arith.subf %517, %494 : vector<8x128xf32>
    %cst_200 = arith.constant 2.000000e-02 : f32
    %519 = vector.broadcast %cst_200 : f32 to vector<8x128xf32>
    %520 = arith.mulf %519, %518 : vector<8x128xf32>
    %521 = arith.addf %494, %520 : vector<8x128xf32>
    %c13_201 = arith.constant 13 : index
    %c0_202 = arith.constant 0 : index
    %c0_203 = arith.constant 0 : index
    %522 = vector.load %arg10[%c13_201, %c0_202, %c0_203] : memref<16x8x128xf32, #tpu.memory_space<vmem>>, vector<1x8x128xf32>
    %523 = vector.shape_cast %522 : vector<1x8x128xf32> to vector<8x128xf32>
    %524 = vector.shape_cast %515 : vector<8x128xf32> to vector<1x8x128xf32>
    tpu.vector_store %arg10[%c13_201, %c0_202, %c0_203], %524 {strides = array<i32>} : memref<16x8x128xf32, #tpu.memory_space<vmem>>, vector<1x8x128xf32>,
    %c14 = arith.constant 14 : index
    %c0_204 = arith.constant 0 : index
    %c0_205 = arith.constant 0 : index
    %525 = vector.load %arg2[%c14, %c0_204, %c0_205] : memref<16x8x128xf32, #tpu.memory_space<vmem>>, vector<1x8x128xf32>
    %526 = vector.shape_cast %525 : vector<1x8x128xf32> to vector<8x128xf32>
    %cst_206 = arith.constant 3.000000e+01 : f32
    %527 = vector.broadcast %cst_206 : f32 to vector<8x128xf32>
    %528 = arith.cmpf oge, %515, %527 : vector<8x128xf32>
    %529 = arith.select %528, %3, %515 : vector<8x128xi1>, vector<8x128xf32>
    %530 = arith.addf %521, %4 : vector<8x128xf32>
    %531 = arith.select %528, %530, %521 : vector<8x128xi1>, vector<8x128xf32>
    %532 = arith.subf %526, %531 : vector<8x128xf32>
    %cst_207 = arith.constant 5.000000e-01 : f32
    %533 = vector.broadcast %cst_207 : f32 to vector<8x128xf32>
    %534 = arith.mulf %533, %532 : vector<8x128xf32>
    %cst_208 = arith.constant 7.000000e+01 : f32
    %535 = vector.broadcast %cst_208 : f32 to vector<8x128xf32>
    %536 = arith.addf %534, %535 : vector<8x128xf32>
    %cst_209 = arith.constant 2.000000e-02 : f32
    %537 = vector.broadcast %cst_209 : f32 to vector<8x128xf32>
    %538 = arith.mulf %537, %529 : vector<8x128xf32>
    %539 = arith.mulf %538, %529 : vector<8x128xf32>
    %cst_210 = arith.constant 2.500000e+00 : f32
    %540 = vector.broadcast %cst_210 : f32 to vector<8x128xf32>
    %541 = arith.mulf %540, %529 : vector<8x128xf32>
    %542 = arith.addf %539, %541 : vector<8x128xf32>
    %543 = arith.addf %542, %536 : vector<8x128xf32>
    %544 = arith.addf %529, %543 : vector<8x128xf32>
    %cst_211 = arith.constant 2.000000e-02 : f32
    %545 = vector.broadcast %cst_211 : f32 to vector<8x128xf32>
    %546 = arith.mulf %545, %544 : vector<8x128xf32>
    %547 = arith.mulf %546, %544 : vector<8x128xf32>
    %cst_212 = arith.constant 2.500000e+00 : f32
    %548 = vector.broadcast %cst_212 : f32 to vector<8x128xf32>
    %549 = arith.mulf %548, %544 : vector<8x128xf32>
    %550 = arith.addf %547, %549 : vector<8x128xf32>
    %551 = arith.addf %550, %536 : vector<8x128xf32>
    %552 = arith.addf %544, %551 : vector<8x128xf32>
    %cst_213 = arith.constant 2.000000e-01 : f32
    %553 = vector.broadcast %cst_213 : f32 to vector<8x128xf32>
    %554 = arith.mulf %553, %552 : vector<8x128xf32>
    %555 = arith.subf %554, %531 : vector<8x128xf32>
    %cst_214 = arith.constant 2.000000e-02 : f32
    %556 = vector.broadcast %cst_214 : f32 to vector<8x128xf32>
    %557 = arith.mulf %556, %555 : vector<8x128xf32>
    %558 = arith.addf %531, %557 : vector<8x128xf32>
    %c14_215 = arith.constant 14 : index
    %c0_216 = arith.constant 0 : index
    %c0_217 = arith.constant 0 : index
    %559 = vector.load %arg10[%c14_215, %c0_216, %c0_217] : memref<16x8x128xf32, #tpu.memory_space<vmem>>, vector<1x8x128xf32>
    %560 = vector.shape_cast %559 : vector<1x8x128xf32> to vector<8x128xf32>
    %561 = vector.shape_cast %552 : vector<8x128xf32> to vector<1x8x128xf32>
    tpu.vector_store %arg10[%c14_215, %c0_216, %c0_217], %561 {strides = array<i32>} : memref<16x8x128xf32, #tpu.memory_space<vmem>>, vector<1x8x128xf32>,
    %c15 = arith.constant 15 : index
    %c0_218 = arith.constant 0 : index
    %c0_219 = arith.constant 0 : index
    %562 = vector.load %arg2[%c15, %c0_218, %c0_219] : memref<16x8x128xf32, #tpu.memory_space<vmem>>, vector<1x8x128xf32>
    %563 = vector.shape_cast %562 : vector<1x8x128xf32> to vector<8x128xf32>
    %cst_220 = arith.constant 3.000000e+01 : f32
    %564 = vector.broadcast %cst_220 : f32 to vector<8x128xf32>
    %565 = arith.cmpf oge, %552, %564 : vector<8x128xf32>
    %566 = arith.select %565, %3, %552 : vector<8x128xi1>, vector<8x128xf32>
    %567 = arith.addf %558, %4 : vector<8x128xf32>
    %568 = arith.select %565, %567, %558 : vector<8x128xi1>, vector<8x128xf32>
    %569 = arith.subf %563, %568 : vector<8x128xf32>
    %cst_221 = arith.constant 5.000000e-01 : f32
    %570 = vector.broadcast %cst_221 : f32 to vector<8x128xf32>
    %571 = arith.mulf %570, %569 : vector<8x128xf32>
    %cst_222 = arith.constant 7.000000e+01 : f32
    %572 = vector.broadcast %cst_222 : f32 to vector<8x128xf32>
    %573 = arith.addf %571, %572 : vector<8x128xf32>
    %cst_223 = arith.constant 2.000000e-02 : f32
    %574 = vector.broadcast %cst_223 : f32 to vector<8x128xf32>
    %575 = arith.mulf %574, %566 : vector<8x128xf32>
    %576 = arith.mulf %575, %566 : vector<8x128xf32>
    %cst_224 = arith.constant 2.500000e+00 : f32
    %577 = vector.broadcast %cst_224 : f32 to vector<8x128xf32>
    %578 = arith.mulf %577, %566 : vector<8x128xf32>
    %579 = arith.addf %576, %578 : vector<8x128xf32>
    %580 = arith.addf %579, %573 : vector<8x128xf32>
    %581 = arith.addf %566, %580 : vector<8x128xf32>
    %cst_225 = arith.constant 2.000000e-02 : f32
    %582 = vector.broadcast %cst_225 : f32 to vector<8x128xf32>
    %583 = arith.mulf %582, %581 : vector<8x128xf32>
    %584 = arith.mulf %583, %581 : vector<8x128xf32>
    %cst_226 = arith.constant 2.500000e+00 : f32
    %585 = vector.broadcast %cst_226 : f32 to vector<8x128xf32>
    %586 = arith.mulf %585, %581 : vector<8x128xf32>
    %587 = arith.addf %584, %586 : vector<8x128xf32>
    %588 = arith.addf %587, %573 : vector<8x128xf32>
    %589 = arith.addf %581, %588 : vector<8x128xf32>
    %cst_227 = arith.constant 2.000000e-01 : f32
    %590 = vector.broadcast %cst_227 : f32 to vector<8x128xf32>
    %591 = arith.mulf %590, %589 : vector<8x128xf32>
    %592 = arith.subf %591, %568 : vector<8x128xf32>
    %cst_228 = arith.constant 2.000000e-02 : f32
    %593 = vector.broadcast %cst_228 : f32 to vector<8x128xf32>
    %594 = arith.mulf %593, %592 : vector<8x128xf32>
    %595 = arith.addf %568, %594 : vector<8x128xf32>
    %c15_229 = arith.constant 15 : index
    %c0_230 = arith.constant 0 : index
    %c0_231 = arith.constant 0 : index
    %596 = vector.load %arg10[%c15_229, %c0_230, %c0_231] : memref<16x8x128xf32, #tpu.memory_space<vmem>>, vector<1x8x128xf32>
    %597 = vector.shape_cast %596 : vector<1x8x128xf32> to vector<8x128xf32>
    %598 = vector.shape_cast %589 : vector<8x128xf32> to vector<1x8x128xf32>
    tpu.vector_store %arg10[%c15_229, %c0_230, %c0_231], %598 {strides = array<i32>} : memref<16x8x128xf32, #tpu.memory_space<vmem>>, vector<1x8x128xf32>,
    %c0_232 = arith.constant 0 : index
    %c0_233 = arith.constant 0 : index
    %599 = vector.load %arg7[%c0_232, %c0_233] : memref<8x128xf32, #tpu.memory_space<vmem>>, vector<8x128xf32>
    tpu.vector_store %arg7[%c0_232, %c0_233], %589 {strides = array<i32>} : memref<8x128xf32, #tpu.memory_space<vmem>>, vector<8x128xf32>,
    %c0_234 = arith.constant 0 : index
    %c0_235 = arith.constant 0 : index
    %600 = vector.load %arg8[%c0_234, %c0_235] : memref<8x128xf32, #tpu.memory_space<vmem>>, vector<8x128xf32>
    tpu.vector_store %arg8[%c0_234, %c0_235], %595 {strides = array<i32>} : memref<8x128xf32, #tpu.memory_space<vmem>>, vector<8x128xf32>,
    %c0_i32_236 = arith.constant 0 : i32
    %601 = arith.cmpi eq, %arg1, %c0_i32_236 : i32
    %602 = arith.extui %601 : i1 to i32
    %c0_i32_237 = arith.constant 0 : i32
    %603 = arith.cmpi ne, %602, %c0_i32_237 : i32
    scf.if %603 {
      %604 = arith.extui %565 : vector<8x128xi1> to vector<8x128xi32>
      %605 = arith.sitofp %604 : vector<8x128xi32> to vector<8x128xf32>
      %c0_238 = arith.constant 0 : index
      %c0_239 = arith.constant 0 : index
      %606 = vector.load %arg9[%c0_238, %c0_239] : memref<8x128xf32, #tpu.memory_space<vmem>>, vector<8x128xf32>
      tpu.vector_store %arg9[%c0_238, %c0_239], %605 {strides = array<i32>} : memref<8x128xf32, #tpu.memory_space<vmem>>, vector<8x128xf32>,
    } else {
    }
    return
  }
  func.func @transform_0(%arg0: i32, %arg1: i32) -> (i32, i32, i32) {
    %c0_i32 = arith.constant 0 : i32
    %c0_i32_0 = arith.constant 0 : i32
    return %arg1, %arg0, %c0_i32 : i32, i32, i32
  }
  func.func @transform_1(%arg0: i32, %arg1: i32) -> (i32, i32) {
    %c0_i32 = arith.constant 0 : i32
    %c0_i32_0 = arith.constant 0 : i32
    return %arg0, %c0_i32 : i32, i32
  }
  func.func @transform_2(%arg0: i32, %arg1: i32) -> (i32, i32) {
    %c0_i32 = arith.constant 0 : i32
    %c0_i32_0 = arith.constant 0 : i32
    return %arg0, %c0_i32 : i32, i32
  }
  func.func @transform_3(%arg0: i32, %arg1: i32) -> (i32, i32) {
    %c0_i32 = arith.constant 0 : i32
    %c0_i32_0 = arith.constant 0 : i32
    return %arg0, %c0_i32 : i32, i32
  }
  func.func @transform_4(%arg0: i32, %arg1: i32) -> (i32, i32) {
    %c0_i32 = arith.constant 0 : i32
    %c0_i32_0 = arith.constant 0 : i32
    return %arg0, %c0_i32 : i32, i32
  }
  func.func @transform_5(%arg0: i32, %arg1: i32) -> (i32, i32) {
    %c0_i32 = arith.constant 0 : i32
    %c0_i32_0 = arith.constant 0 : i32
    return %arg0, %c0_i32 : i32, i32
  }
  func.func @transform_6(%arg0: i32, %arg1: i32) -> (i32, i32) {
    %c0_i32 = arith.constant 0 : i32
    %c0_i32_0 = arith.constant 0 : i32
    return %arg0, %c0_i32 : i32, i32
  }
  func.func @transform_7(%arg0: i32, %arg1: i32) -> (i32, i32) {
    %c0_i32 = arith.constant 0 : i32
    %c0_i32_0 = arith.constant 0 : i32
    return %arg0, %c0_i32 : i32, i32
  }
  func.func @transform_8(%arg0: i32, %arg1: i32) -> (i32, i32, i32) {
    %c0_i32 = arith.constant 0 : i32
    %c0_i32_0 = arith.constant 0 : i32
    return %arg1, %arg0, %c0_i32 : i32, i32, i32
  }
}

</mosaic_0001>

<bundles_post_ra>
// kernel: izhikevich_simulate.1
= control target key start
LH: loop header
LB: loop body
LE: loop exit
PB: predicated region body
PF: predicated region fallthrough
CT: control target
= control target key end

     0   :  { %s2123_s0 = inlined_call_operand.vmem [shape: f32[16,16,128], index: 0, kind: input, shape index: {}]   ;;  %s2124_s1 = inlined_call_operand.vmem [shape: f32[16,128], index: 1, kind: input, shape index: {}]   ;;  %s2125_s2 = inlined_call_operand.vmem [shape: f32[16,128], index: 2, kind: input, shape index: {}]   ;;  %s2126_s3 = inlined_call_operand.hbm [shape: f32[16,128], index: 3, kind: input, shape index: {}, may-alias: {3,5}]   ;;  %s2127_s4 = inlined_call_operand.hbm [shape: f32[16,128], index: 4, kind: input, shape index: {}, may-alias: {4,6}]   ;;  %s2128_s5 = inlined_call_operand.hbm [shape: f32[16,128], index: 5, kind: output, shape index: {0}, may-alias: {3,5}]   ;;  %s2129_s6 = inlined_call_operand.hbm [shape: f32[16,128], index: 6, kind: output, shape index: {1}, may-alias: {4,6}]   ;;  %s2130_s7 = inlined_call_operand.hbm [shape: f32[16,128], index: 7, kind: output, shape index: {2}]   ;;  %s2131_s8 = inlined_call_operand.hbm [shape: f32[16,16,128], index: 8, kind: output, shape index: {3}]  }
   0x1   :  { %2138 = sst [smem:[#allocation24_spill]] %s2123_s0 }
   0x2   :  { %2139 = sst [smem:[#allocation25_spill]] %s2126_s3 }
   0x3   :  { %14 = vsyncpa [#allocation4], 0 }
   0x4   :  { %16 = vsyncpa [#allocation4 + $0x1], 0 }
   0x5   :  { %17 = vsyncpa [#allocation7], 0 }
   0x6   :  { %19 = vsyncpa [#allocation7 + $0x1], 0 }
   0x7   :  { %20 = vsyncpa [#allocation5], 0 }
   0x8   :  { %22 = vsyncpa [#allocation5 + $0x1], 0 }
   0x9   :  { %23 = vsyncpa [#allocation10], 0 }
   0xa   :  { %25 = vsyncpa [#allocation10 + $0x1], 0 }
   0xb   :  { %26 = vsyncpa [#allocation13], 0 }
   0xc   :  { %28 = vsyncpa [#allocation13 + $0x1], 0  ;;  %s1737_s27 = smov 0   ;;  %s1739_s28 = smov 0  }
   0xd   :  { %s1741_s29 = smov 0   ;;  %s1743_s30 = smov 0  }
   0xe   :  { %s1745_s9 = smov 0   ;;  %s1747_s10 = smov 0  }
   0xf LB: > { %2140 = sst [smem:[#allocation19_spill]] %s1668_s29  ;;  %s1768_s11 = sadd.s32 4294967295, %s1680_s10   ;;  %s1680_s10 = sphi %s1747_s10, %s34_s10   ;;  %s1676_s9 = sphi %s1745_s9, %s2157_s9   ;;  %s1672_s30 = sphi %s1743_s30, %s2156_s30   ;;  %s1668_s29 = sphi %s1741_s29, %s2155_s29   ;;  %s1664_s28 = sphi %s1739_s28, %s2159_s28   ;;  %s1660_s27 = sphi %s1737_s27, %s2158_s27  }
  0x10   : > { %2141 = sst [smem:[#allocation20_spill]] %s1676_s9  ;;  %s2132_s12 = sadd.s32 4294967294, %s1680_s10  }
  0x11   : > { %s46_s13 = sadd.s32 1, %s1676_s9  ;;  %s55_s14 = sadd.s32 1, %s1668_s29 }
  0x12   : > { %p48_p0 = scmp.ge.s32.totalorder %s46_s13, 2  ;;  %p62_p1 = scmp.ne.s32.totalorder %s1668_s29, %s1664_s28 }
  0x13   : > { %p63_p2 = scmp.eq.s32.totalorder %s1680_s10, 0  ;;  %p146_p3 = scmp.ne.s32.totalorder %s1664_s28, %s1660_s27 }
  0x14   : > { %s2161_s13 = smov (%p48_p0, %s46_s13), 0  ;;  %p147_p5 = scmp.eq.s32.totalorder %s1768_s11, 0 }
  0x15   : > { %2142 = sst [smem:[#allocation21_spill]] %s2161_s13  ;;  %p1780_p4 = por %p63_p2, %p62_p1 }
  0x16   : > { %s51_s16 = ssub.s32 %s1676_s9, %s2161_s13  ;;  %p196_p6 = scmp.eq.s32.totalorder %s1768_s11, 1 }
  0x17   : > { %p53_p7 = scmp.eq.s32.totalorder %s51_s16, 0  ;;  %p1788_p8 = por %p147_p5, %p146_p3 }
  0x18   : > { %p1792_p9 = por %p196_p6, %p62_p1  ;;  %p202_p10 = scmp.eq.s32.totalorder %s2132_s12, 1 }
  0x19   : > { %s1799_s19 = scalar_select %p53_p7, %s1668_s29, %s55_s14  }
  0x1a   : > { %p1801_p11 = por %p202_p10, %p146_p3  ;;  %p2137_p12 = scmp.ge.s32.totalorder %s1680_s10, 2 }
  0x1b   : > { %2146 = sst [smem:[#allocation22_spill]] %s1799_s19 }
  0x1c   : > { %s2147_s20 = scalar_select %p1801_p11, 1, 0 }
  0x1d   : > { %298 = sbr.rel (%p2137_p12) target bundleno = 80 (0x50), region = 16 }
  0x1e   : > { %2148 = sst [smem:[#allocation23_spill]] %s2147_s20 }
  0x22   : > { %301 = sbr.rel (!%p1780_p4) target bundleno = 52 (0x34), region = 20  ;;  %s303_s21 = sand.u32 (%p1780_p4), 1, %s1668_s29  }
  0x23   : > { %s1324_s22 = sshll.u32 (%p1780_p4), %s1676_s9, 3  ;;  %s1323_s23 = sshll.u32 (%p1780_p4), %s303_s21, 7 }
  0x24   : > { %s2149_s0 = sld [smem:[#allocation24_spill]] (%p1780_p4)  ;;  %s305_s14 = scalar_lea.vmem (%p1780_p4), [#allocation2], %s1323_s23 }
  0x2a   : > { %s1815_s26 = scalar_lea.vmem %s2149_s0, %s1324_s22 }
  0x2b   : > { %v369_v0 = vld [vmem:[%s1815_s26] sm:$0xff]  ;;  %v371_v1 = vld [vmem:[%s1815_s26 + $0x10] sm:$0xff] }
  0x2c   : > { %v373_v2 = vld [vmem:[%s1815_s26 + $0x20] sm:$0xff]  ;;  %370 = vst [vmem:[%s305_s14] sm:$0xff] %v369_v0  ;;  %372 = vst [vmem:[%s305_s14 + $0x8] sm:$0xff] %v371_v1  ;;  %v375_v3 = vld [vmem:[%s1815_s26 + $0x30] sm:$0xff] }
  0x2d   : > { %374 = vst [vmem:[%s305_s14 + $0x10] sm:$0xff] %v373_v2  ;;  %v377_v4 = vld [vmem:[%s1815_s26 + $0x40] sm:$0xff]  ;;  %v379_v5 = vld [vmem:[%s1815_s26 + $0x50] sm:$0xff]  ;;  %376 = vst [vmem:[%s305_s14 + $0x18] sm:$0xff] %v375_v3 }
  0x2e   : > { %378 = vst [vmem:[%s305_s14 + $0x20] sm:$0xff] %v377_v4  ;;  %380 = vst [vmem:[%s305_s14 + $0x28] sm:$0xff] %v379_v5  ;;  %v381_v6 = vld [vmem:[%s1815_s26 + $0x60] sm:$0xff]  ;;  %v383_v7 = vld [vmem:[%s1815_s26 + $0x70] sm:$0xff] }
  0x2f   : > { %v385_v8 = vld [vmem:[%s1815_s26 + $0x80] sm:$0xff]  ;;  %382 = vst [vmem:[%s305_s14 + $0x30] sm:$0xff] %v381_v6  ;;  %384 = vst [vmem:[%s305_s14 + $0x38] sm:$0xff] %v383_v7  ;;  %v387_v9 = vld [vmem:[%s1815_s26 + $0x90] sm:$0xff] }
  0x30   : > { %386 = vst [vmem:[%s305_s14 + $0x40] sm:$0xff] %v385_v8  ;;  %v389_v10 = vld [vmem:[%s1815_s26 + $0xa0] sm:$0xff]  ;;  %v391_v11 = vld [vmem:[%s1815_s26 + $0xb0] sm:$0xff]  ;;  %388 = vst [vmem:[%s305_s14 + $0x48] sm:$0xff] %v387_v9 }
  0x31   : > { %390 = vst [vmem:[%s305_s14 + $0x50] sm:$0xff] %v389_v10  ;;  %392 = vst [vmem:[%s305_s14 + $0x58] sm:$0xff] %v391_v11  ;;  %v393_v12 = vld [vmem:[%s1815_s26 + $0xc0] sm:$0xff]  ;;  %v395_v13 = vld [vmem:[%s1815_s26 + $0xd0] sm:$0xff] }
  0x32   : > { %v397_v14 = vld [vmem:[%s1815_s26 + $0xe0] sm:$0xff]  ;;  %394 = vst [vmem:[%s305_s14 + $0x60] sm:$0xff] %v393_v12  ;;  %396 = vst [vmem:[%s305_s14 + $0x68] sm:$0xff] %v395_v13  ;;  %v399_v15 = vld [vmem:[%s1815_s26 + $0xf0] sm:$0xff] }
  0x33   : > { %398 = vst [vmem:[%s305_s14 + $0x70] sm:$0xff] %v397_v14  ;;  %400 = vst [vmem:[%s305_s14 + $0x78] sm:$0xff] %v399_v15 }
  0x34 PF: > { %s1834_s16 = sand.u32 1, %s1668_s29   ;;  %s1326_s21 = sshll.u32 %s1676_s9, 7 }
  0x35   : > { %s1325_s22 = sshll.u32 %s1834_s16, 3  ;;  %s2150_s3 = sld [smem:[#allocation25_spill]] }
  0x36   : > { %s425_s12 = scalar_lea.vmem [#allocation3], %s1325_s22  ;;  %s422_s13 = scalar_lea.sflag [#allocation4], %s1834_s16 }
  0x37   : > { %s432_s0 = sshll.u32 %s425_s12, 4  ;;  %s1682_s14 = smov [#allocation3]   ;;  %s433_s0 = int_to_ptr.vmem [resolvable:$true] %s432_s0 }
  0x38   : > { %s1470_s26 = scalar_lea.vmem %s433_s0, 128  ;;  %s1474_s19 = sshll.u32 %s1682_s14, 4  ;;  %s1475_s19 = int_to_ptr.vmem [resolvable:$false] %s1474_s19 }
  0x39   : > { %p1471_p13 = scmp.ne.s32.totalorder %s433_s0, %s1470_s26  ;;  %s1476_s29 = scalar_lea.vmem %s1475_s19, 256 }
  0x3a   : > { %p1477_p2 = scmp.lt.s32.totalorder %s433_s0, %s1475_s19  ;;  %p1478_p3 = scmp.lt.s32.totalorder %s1476_s29, %s1470_s26 }
  0x3b   : > { %s430_s25 = scalar_lea.hbm %s2150_s3, %s1326_s21  ;;  %p1472_p0 = pnand %p1471_p13, %p1780_p4 }
  0x3c   : > { %p1479_p5 = por %p1478_p3, %p1477_p2 }
  0x3d   : > { %p1473_p1 = pneg %p1472_p0 }
  0x3f   : > { %p1480_p6 = pnand %p1479_p5, %p1473_p1 }
  0x41   : > { %1483 = shalt.err (!%p1480_p6)
}
  0x42   : > { %1380 = dma.hbm_to_vmem [thread:$0]  (%p1780_p4), %s430_s25, 128, %s433_s0, %s422_s13  }
  0x43   : > { %s448_s24 = scalar_lea.hbm %s2127_s4, %s1326_s21  ;;  %s443_s3 = scalar_lea.vmem [#allocation6], %s1325_s22 }
  0x44   : > { %s450_s9 = sshll.u32 %s443_s3, 4  ;;  %s440_s14 = scalar_lea.sflag [#allocation7], %s1834_s16  ;;  %s451_s9 = int_to_ptr.vmem [resolvable:$true] %s450_s9 }
  0x45   : > { %s1496_s20 = scalar_lea.vmem %s451_s9, 128  ;;  %s1683_s29 = smov [#allocation6]  }
  0x46   : > { %p1497_p7 = scmp.ne.s32.totalorder %s451_s9, %s1496_s20  ;;  %s1500_s19 = sshll.u32 %s1683_s29, 4  ;;  %s1501_s19 = int_to_ptr.vmem [resolvable:$false] %s1500_s19 }
  0x47   : > { %s1502_s26 = scalar_lea.vmem %s1501_s19, 256  ;;  %p1503_p0 = scmp.lt.s32.totalorder %s451_s9, %s1501_s19 }
  0x48   : > { %p1498_p10 = pnand %p1497_p7, %p1780_p4  ;;  %p1504_p1 = scmp.lt.s32.totalorder %s1502_s26, %s1496_s20 }
  0x4a   : > { %p1499_p13 = pneg %p1498_p10  ;;  %p1505_p2 = por %p1504_p1, %p1503_p0 }
  0x4c   : > { %p1506_p3 = pnand %p1505_p2, %p1499_p13 }
  0x4e   : > { %1509 = shalt.err (!%p1506_p3)
}
  0x4f   : > { %1381 = dma.hbm_to_vmem [thread:$0]  (%p1780_p4), %s448_s24, 128, %s451_s9, %s440_s14  }
  0x50 PF: > { %p1329_p5 = scmp.ge.s32.totalorder %s1680_s10, 1  ;;  %p455_p6 = scmp.lt.s32.totalorder %s1680_s10, 3 }
  0x52   : > { %p456_p12 = pnand %p1329_p5, %p455_p6 }
  0x53   : > { %s1857_s0 = sand.u32 (!%p456_p12), 1, %s1664_s28  }
  0x54   : > { %459 = sbr.rel (%p456_p12) target bundleno = 670 (0x29e), region = 74  ;;  %s1330_s3 = sshll.u32 (!%p456_p12), %s1857_s0, 7 }
  0x55   : > { %s1861_s13 = sshll.u32 (!%p456_p12), %s1857_s0, 3  ;;  %s1865_s9 = scalar_lea.vmem (!%p456_p12), [#allocation2], %s1330_s3 }
  0x56   : > { %s469_s15 = scalar_lea.sflag (!%p456_p12), [#allocation4], %s1857_s0  ;;  %s472_s20 = scalar_lea.vmem (!%p456_p12), [#allocation3], %s1861_s13 }
  0x59   : > { %1639 = dma.done.wait (%p1788_p8), %s469_s15, 128  }
  0x5a   : > { %1641 = vsyncadd (%p1788_p8), %s469_s15, 4294967168  ;;  %s478_s16 = scalar_lea.sflag [#allocation7], %s1857_s0  ;;  %s481_s21 = scalar_lea.vmem [#allocation6], %s1861_s13 }
  0x5b   : > { %1643 = dma.done.wait (%p1788_p8), %s478_s16, 128  }
  0x5c   : > { %1645 = vsyncadd (%p1788_p8), %s478_s16, 4294967168  ;;  %p547_p4 = scmp.lt.s32.totalorder %s1672_s30, 1  ;;  %v560_v16 = vld [vmem:[%s472_s20] sm:$0xff]  ;;  %v562_v18 = vld [vmem:[%s481_s21] sm:$0xff]  ;;  %s1896_s17 = scalar_lea.vmem [#allocation12], %s1330_s3 }
  0x5d   : > { %vm569_vm0 = vcmp.ge.f32.partialorder %v560_v16, 30.0  ;;  %v568_v21 = vld [vmem:[%s1865_s9] sm:$0xff]  ;;  %v1339_v45 = vld [vmem:[%s1865_s9 + $0x8] sm:$0xff]  ;;  %v1341_v5 = vld [vmem:[%s1865_s9 + $0x10] sm:$0xff]  ;;  %s538_s26 = scalar_lea.vmem [#allocation11], %s1861_s13  ;;  %s1965_s3 = sshll.u32 %s1672_s30, 7 }
  0x5e   : > { %s548_s22 = scalar_select %p547_p4, %s1672_s30, 1 }
  0x5f   : > { %s1972_s21 = scalar_lea.hbm %s2131_s8, %s1965_s3  ;;  %s1979_s23 = scalar_lea.hbm %s2128_s5, %s1965_s3 }
  0x60   : > { %s1337_s25 = sshll.u32 %s548_s22, 3  ;;  %s1076_s22 = sshll.u32 %s1896_s17, 4  ;;  %s1983_s22 = int_to_ptr.vmem [resolvable:$true] %s1076_s22 }
  0x61   : > { %s550_s24 = scalar_lea.vmem %s2124_s1, %s1337_s25  ;;  %s554_s19 = scalar_lea.vmem %s2125_s2, %s1337_s25 }
  0x62   : > { %v1887_v17 = vld [vmem:[%s550_s24] sm:$0xff]  ;;  %s1011_s30 = sand.u32 1, %s1768_s11   ;;  %s1007_s24 = scalar_lea.sflag [#allocation5], %s1857_s0 }
  0x63   : > { %v1889_v19 = vld [vmem:[%s554_s19] sm:$0xff]  ;;  %v570_v20 = vsel %vm569_vm0, %v1887_v17, %v560_v16  ;;  %s1685_s29 = smov [#allocation8]  }
  0x64   : > { %v571_v22 = vadd.f32 %v1889_v19, %v562_v18  ;;  %v576_v23 = vmul.f32 0.02, %v570_v20  ;;  %v578_v24 = vmul.f32 2.5, %v570_v20  ;;  %s1514_s19 = sshll.u32 %s1685_s29, 4  ;;  %s1515_s19 = int_to_ptr.vmem [resolvable:$false] %s1514_s19 }
  0x65   : > { %s1516_s20 = scalar_lea.vmem %s1515_s19, 256 }
  0x66   : > { %v572_v25 = vsel %vm569_vm0, %v571_v22, %v562_v18  ;;  %v577_v26 = vmul.f32 %v576_v23, %v570_v20 }
  0x67   : > { %v573_v27 = vsub.f32 %v568_v21, %v572_v25 }
  0x68   : > { %v579_v29 = vadd.f32 %v578_v24, %v577_v26 }
  0x69   : > { %v574_v28 = vmul.f32 0.5, %v573_v27 }
  0x6b   : > { %v575_v30 = vadd.f32 70.0, %v574_v28 }
  0x6d   : > { %v580_v31 = vadd.f32 %v579_v29, %v575_v30 }
  0x6f   : > { %v581_v32 = vadd.f32 %v580_v31, %v570_v20 }
  0x71   : > { %v582_v33 = vmul.f32 0.02, %v581_v32  ;;  %v584_v34 = vmul.f32 2.5, %v581_v32 }
  0x73   : > { %v583_v35 = vmul.f32 %v582_v33, %v581_v32 }
  0x75   : > { %v585_v36 = vadd.f32 %v584_v34, %v583_v35 }
  0x77   : > { %v586_v37 = vadd.f32 %v585_v36, %v575_v30  ;;  %v1343_v30 = vld [vmem:[%s1865_s9 + $0x18] sm:$0xff] }
  0x79   : > { %v587_v38 = vadd.f32 %v586_v37, %v581_v32 }
  0x7b   : > { %v588_v39 = vmul.f32 0.2, %v587_v38  ;;  %592 = vst [vmem:[%s1896_s17] sm:$0xff] %v587_v38  ;;  %vm595_vm1 = vcmp.ge.f32.partialorder %v587_v38, 30.0 }
  0x7c   : > { %v596_v41 = vsel %vm595_vm1, %v1887_v17, %v587_v38 }
  0x7d   : > { %v589_v40 = vsub.f32 %v588_v39, %v572_v25  ;;  %v602_v43 = vmul.f32 0.02, %v596_v41  ;;  %v604_v48 = vmul.f32 2.5, %v596_v41 }
  0x7f   : > { %v590_v42 = vmul.f32 0.02, %v589_v40  ;;  %v603_v47 = vmul.f32 %v602_v43, %v596_v41 }
  0x81   : > { %v591_v44 = vadd.f32 %v590_v42, %v572_v25  ;;  %v605_v52 = vadd.f32 %v604_v48, %v603_v47 }
  0x83   : > { %v597_v46 = vadd.f32 %v591_v44, %v1889_v19 }
  0x85   : > { %v598_v49 = vsel %vm595_vm1, %v597_v46, %v591_v44 }
  0x86   : > { %v599_v50 = vsub.f32 %v1339_v45, %v598_v49 }
  0x88   : > { %v600_v51 = vmul.f32 0.5, %v599_v50 }
  0x8a   : > { %v601_v53 = vadd.f32 70.0, %v600_v51 }
  0x8c   : > { %v606_v54 = vadd.f32 %v605_v52, %v601_v53 }
  0x8e   : > { %v607_v55 = vadd.f32 %v606_v54, %v596_v41 }
  0x90   : > { %v608_v56 = vmul.f32 0.02, %v607_v55  ;;  %v610_v57 = vmul.f32 2.5, %v607_v55 }
  0x92   : > { %v609_v58 = vmul.f32 %v608_v56, %v607_v55 }
  0x94   : > { %v611_v59 = vadd.f32 %v610_v57, %v609_v58 }
  0x96   : > { %v612_v60 = vadd.f32 %v611_v59, %v601_v53  ;;  %v1345_v53 = vld [vmem:[%s1865_s9 + $0x20] sm:$0xff] }
  0x98   : > { %v613_v61 = vadd.f32 %v612_v60, %v607_v55 }
  0x9a   : > { %v614_v62 = vmul.f32 0.2, %v613_v61  ;;  %1340 = vst [vmem:[%s1896_s17 + $0x8] sm:$0xff] %v613_v61  ;;  %vm622_vm2 = vcmp.ge.f32.partialorder %v613_v61, 30.0 }
  0x9b   : > { %v623_v0 = vsel %vm622_vm2, %v1887_v17, %v613_v61 }
  0x9c   : > { %v615_v63 = vsub.f32 %v614_v62, %v598_v49  ;;  %v629_v2 = vmul.f32 0.02, %v623_v0  ;;  %v631_v7 = vmul.f32 2.5, %v623_v0 }
  0x9e   : > { %v616_v1 = vmul.f32 0.02, %v615_v63  ;;  %v630_v6 = vmul.f32 %v629_v2, %v623_v0 }
  0xa0   : > { %v617_v3 = vadd.f32 %v616_v1, %v598_v49  ;;  %v632_v11 = vadd.f32 %v631_v7, %v630_v6 }
  0xa2   : > { %v624_v4 = vadd.f32 %v617_v3, %v1889_v19 }
  0xa4   : > { %v625_v8 = vsel %vm622_vm2, %v624_v4, %v617_v3 }
  0xa5   : > { %v626_v9 = vsub.f32 %v1341_v5, %v625_v8 }
  0xa7   : > { %v627_v10 = vmul.f32 0.5, %v626_v9 }
  0xa9   : > { %v628_v12 = vadd.f32 70.0, %v627_v10 }
  0xab   : > { %v633_v13 = vadd.f32 %v632_v11, %v628_v12 }
  0xad   : > { %v634_v14 = vadd.f32 %v633_v13, %v623_v0 }
  0xaf   : > { %v635_v15 = vmul.f32 0.02, %v634_v14  ;;  %v637_v16 = vmul.f32 2.5, %v634_v14 }
  0xb1   : > { %v636_v18 = vmul.f32 %v635_v15, %v634_v14 }
  0xb3   : > { %v638_v20 = vadd.f32 %v637_v16, %v636_v18 }
  0xb5   : > { %v639_v21 = vadd.f32 %v638_v20, %v628_v12  ;;  %v1347_v12 = vld [vmem:[%s1865_s9 + $0x28] sm:$0xff] }
  0xb7   : > { %v640_v22 = vadd.f32 %v639_v21, %v634_v14 }
  0xb9   : > { %v641_v23 = vmul.f32 0.2, %v640_v22  ;;  %1342 = vst [vmem:[%s1896_s17 + $0x10] sm:$0xff] %v640_v22  ;;  %vm649_vm3 = vcmp.ge.f32.partialorder %v640_v22, 30.0 }
  0xba   : > { %v650_v25 = vsel %vm649_vm3, %v1887_v17, %v640_v22 }
  0xbb   : > { %v642_v24 = vsub.f32 %v641_v23, %v625_v8  ;;  %v656_v27 = vmul.f32 0.02, %v650_v25  ;;  %v658_v32 = vmul.f32 2.5, %v650_v25 }
  0xbd   : > { %v643_v26 = vmul.f32 0.02, %v642_v24  ;;  %v657_v31 = vmul.f32 %v656_v27, %v650_v25 }
  0xbf   : > { %v644_v28 = vadd.f32 %v643_v26, %v625_v8  ;;  %v659_v36 = vadd.f32 %v658_v32, %v657_v31 }
  0xc1   : > { %v651_v29 = vadd.f32 %v644_v28, %v1889_v19 }
  0xc3   : > { %v652_v33 = vsel %vm649_vm3, %v651_v29, %v644_v28 }
  0xc4   : > { %v653_v34 = vsub.f32 %v1343_v30, %v652_v33 }
  0xc6   : > { %v654_v35 = vmul.f32 0.5, %v653_v34 }
  0xc8   : > { %v655_v37 = vadd.f32 70.0, %v654_v35 }
  0xca   : > { %v660_v38 = vadd.f32 %v659_v36, %v655_v37 }
  0xcc   : > { %v661_v39 = vadd.f32 %v660_v38, %v650_v25 }
  0xce   : > { %v662_v40 = vmul.f32 0.02, %v661_v39  ;;  %v664_v41 = vmul.f32 2.5, %v661_v39 }
  0xd0   : > { %v663_v42 = vmul.f32 %v662_v40, %v661_v39 }
  0xd2   : > { %v665_v43 = vadd.f32 %v664_v41, %v663_v42 }
  0xd4   : > { %v666_v44 = vadd.f32 %v665_v43, %v655_v37  ;;  %v1349_v37 = vld [vmem:[%s1865_s9 + $0x30] sm:$0xff] }
  0xd6   : > { %v667_v45 = vadd.f32 %v666_v44, %v661_v39 }
  0xd8   : > { %v668_v46 = vmul.f32 0.2, %v667_v45  ;;  %1344 = vst [vmem:[%s1896_s17 + $0x18] sm:$0xff] %v667_v45  ;;  %vm676_vm4 = vcmp.ge.f32.partialorder %v667_v45, 30.0 }
  0xd9   : > { %v677_v48 = vsel %vm676_vm4, %v1887_v17, %v667_v45 }
  0xda   : > { %v669_v47 = vsub.f32 %v668_v46, %v652_v33  ;;  %v683_v50 = vmul.f32 0.02, %v677_v48  ;;  %v685_v55 = vmul.f32 2.5, %v677_v48 }
  0xdc   : > { %v670_v49 = vmul.f32 0.02, %v669_v47  ;;  %v684_v54 = vmul.f32 %v683_v50, %v677_v48 }
  0xde   : > { %v671_v51 = vadd.f32 %v670_v49, %v652_v33  ;;  %v686_v59 = vadd.f32 %v685_v55, %v684_v54 }
  0xe0   : > { %v678_v52 = vadd.f32 %v671_v51, %v1889_v19 }
  0xe2   : > { %v679_v56 = vsel %vm676_vm4, %v678_v52, %v671_v51 }
  0xe3   : > { %v680_v57 = vsub.f32 %v1345_v53, %v679_v56 }
  0xe5   : > { %v681_v58 = vmul.f32 0.5, %v680_v57 }
  0xe7   : > { %v682_v60 = vadd.f32 70.0, %v681_v58 }
  0xe9   : > { %v687_v61 = vadd.f32 %v686_v59, %v682_v60 }
  0xeb   : > { %v688_v62 = vadd.f32 %v687_v61, %v677_v48 }
  0xed   : > { %v689_v63 = vmul.f32 0.02, %v688_v62  ;;  %v691_v0 = vmul.f32 2.5, %v688_v62 }
  0xef   : > { %v690_v1 = vmul.f32 %v689_v63, %v688_v62 }
  0xf1   : > { %v692_v2 = vadd.f32 %v691_v0, %v690_v1 }
  0xf3   : > { %v693_v3 = vadd.f32 %v692_v2, %v682_v60  ;;  %v1351_v60 = vld [vmem:[%s1865_s9 + $0x38] sm:$0xff] }
  0xf5   : > { %v694_v4 = vadd.f32 %v693_v3, %v688_v62 }
  0xf7   : > { %v695_v5 = vmul.f32 0.2, %v694_v4  ;;  %1346 = vst [vmem:[%s1896_s17 + $0x20] sm:$0xff] %v694_v4  ;;  %vm703_vm5 = vcmp.ge.f32.partialorder %v694_v4, 30.0 }
  0xf8   : > { %v704_v7 = vsel %vm703_vm5, %v1887_v17, %v694_v4 }
  0xf9   : > { %v696_v6 = vsub.f32 %v695_v5, %v679_v56  ;;  %v710_v9 = vmul.f32 0.02, %v704_v7  ;;  %v712_v14 = vmul.f32 2.5, %v704_v7 }
  0xfb   : > { %v697_v8 = vmul.f32 0.02, %v696_v6  ;;  %v711_v13 = vmul.f32 %v710_v9, %v704_v7 }
  0xfd   : > { %v698_v10 = vadd.f32 %v697_v8, %v679_v56  ;;  %v713_v20 = vadd.f32 %v712_v14, %v711_v13 }
  0xff   : > { %v705_v11 = vadd.f32 %v698_v10, %v1889_v19 }
 0x101   : > { %v706_v15 = vsel %vm703_vm5, %v705_v11, %v698_v10 }
 0x102   : > { %v707_v16 = vsub.f32 %v1347_v12, %v706_v15 }
 0x104   : > { %v708_v18 = vmul.f32 0.5, %v707_v16 }
 0x106   : > { %v709_v21 = vadd.f32 70.0, %v708_v18 }
 0x108   : > { %v714_v22 = vadd.f32 %v713_v20, %v709_v21 }
 0x10a   : > { %v715_v23 = vadd.f32 %v714_v22, %v704_v7 }
 0x10c   : > { %v716_v24 = vmul.f32 0.02, %v715_v23  ;;  %v718_v25 = vmul.f32 2.5, %v715_v23 }
 0x10e   : > { %v717_v26 = vmul.f32 %v716_v24, %v715_v23 }
 0x110   : > { %v719_v27 = vadd.f32 %v718_v25, %v717_v26 }
 0x112   : > { %v720_v28 = vadd.f32 %v719_v27, %v709_v21  ;;  %v1353_v21 = vld [vmem:[%s1865_s9 + $0x40] sm:$0xff] }
 0x114   : > { %v721_v29 = vadd.f32 %v720_v28, %v715_v23 }
 0x116   : > { %v722_v30 = vmul.f32 0.2, %v721_v29  ;;  %1348 = vst [vmem:[%s1896_s17 + $0x28] sm:$0xff] %v721_v29  ;;  %vm730_vm6 = vcmp.ge.f32.partialorder %v721_v29, 30.0 }
 0x117   : > { %v731_v32 = vsel %vm730_vm6, %v1887_v17, %v721_v29 }
 0x118   : > { %v723_v31 = vsub.f32 %v722_v30, %v706_v15  ;;  %v737_v34 = vmul.f32 0.02, %v731_v32  ;;  %v739_v39 = vmul.f32 2.5, %v731_v32 }
 0x11a   : > { %v724_v33 = vmul.f32 0.02, %v723_v31  ;;  %v738_v38 = vmul.f32 %v737_v34, %v731_v32 }
 0x11c   : > { %v725_v35 = vadd.f32 %v724_v33, %v706_v15  ;;  %v740_v43 = vadd.f32 %v739_v39, %v738_v38 }
 0x11e   : > { %v732_v36 = vadd.f32 %v725_v35, %v1889_v19 }
 0x120   : > { %v733_v40 = vsel %vm730_vm6, %v732_v36, %v725_v35 }
 0x121   : > { %v734_v41 = vsub.f32 %v1349_v37, %v733_v40 }
 0x123   : > { %v735_v42 = vmul.f32 0.5, %v734_v41 }
 0x125   : > { %v736_v44 = vadd.f32 70.0, %v735_v42 }
 0x127   : > { %v741_v45 = vadd.f32 %v740_v43, %v736_v44 }
 0x129   : > { %v742_v46 = vadd.f32 %v741_v45, %v731_v32 }
 0x12b   : > { %v743_v47 = vmul.f32 0.02, %v742_v46  ;;  %v745_v48 = vmul.f32 2.5, %v742_v46 }
 0x12d   : > { %v744_v49 = vmul.f32 %v743_v47, %v742_v46 }
 0x12f   : > { %v746_v50 = vadd.f32 %v745_v48, %v744_v49 }
 0x131   : > { %v747_v51 = vadd.f32 %v746_v50, %v736_v44  ;;  %v1355_v44 = vld [vmem:[%s1865_s9 + $0x48] sm:$0xff] }
 0x133   : > { %v748_v52 = vadd.f32 %v747_v51, %v742_v46 }
 0x135   : > { %v749_v53 = vmul.f32 0.2, %v748_v52  ;;  %1350 = vst [vmem:[%s1896_s17 + $0x30] sm:$0xff] %v748_v52  ;;  %vm757_vm7 = vcmp.ge.f32.partialorder %v748_v52, 30.0 }
 0x136   : > { %v758_v55 = vsel %vm757_vm7, %v1887_v17, %v748_v52 }
 0x137   : > { %v750_v54 = vsub.f32 %v749_v53, %v733_v40  ;;  %v764_v57 = vmul.f32 0.02, %v758_v55  ;;  %v766_v62 = vmul.f32 2.5, %v758_v55 }
 0x139   : > { %v751_v56 = vmul.f32 0.02, %v750_v54  ;;  %v765_v61 = vmul.f32 %v764_v57, %v758_v55 }
 0x13b   : > { %v752_v58 = vadd.f32 %v751_v56, %v733_v40  ;;  %v767_v2 = vadd.f32 %v766_v62, %v765_v61 }
 0x13d   : > { %v759_v59 = vadd.f32 %v752_v58, %v1889_v19 }
 0x13f   : > { %v760_v63 = vsel %vm757_vm7, %v759_v59, %v752_v58 }
 0x140   : > { %v761_v0 = vsub.f32 %v1351_v60, %v760_v63 }
 0x142   : > { %v762_v1 = vmul.f32 0.5, %v761_v0 }
 0x144   : > { %v763_v3 = vadd.f32 70.0, %v762_v1 }
 0x146   : > { %v768_v4 = vadd.f32 %v767_v2, %v763_v3 }
 0x148   : > { %v769_v5 = vadd.f32 %v768_v4, %v758_v55 }
 0x14a   : > { %v770_v6 = vmul.f32 0.02, %v769_v5  ;;  %v772_v7 = vmul.f32 2.5, %v769_v5 }
 0x14c   : > { %v771_v8 = vmul.f32 %v770_v6, %v769_v5 }
 0x14e   : > { %v773_v9 = vadd.f32 %v772_v7, %v771_v8 }
 0x150   : > { %v774_v10 = vadd.f32 %v773_v9, %v763_v3  ;;  %v1357_v3 = vld [vmem:[%s1865_s9 + $0x50] sm:$0xff] }
 0x152   : > { %v775_v11 = vadd.f32 %v774_v10, %v769_v5 }
 0x154   : > { %v776_v12 = vmul.f32 0.2, %v775_v11  ;;  %1352 = vst [vmem:[%s1896_s17 + $0x38] sm:$0xff] %v775_v11  ;;  %vm784_vm8 = vcmp.ge.f32.partialorder %v775_v11, 30.0 }
 0x155   : > { %v785_v14 = vsel %vm784_vm8, %v1887_v17, %v775_v11 }
 0x156   : > { %v777_v13 = vsub.f32 %v776_v12, %v760_v63  ;;  %v791_v16 = vmul.f32 0.02, %v785_v14  ;;  %v793_v23 = vmul.f32 2.5, %v785_v14 }
 0x158   : > { %v778_v15 = vmul.f32 0.02, %v777_v13  ;;  %v792_v22 = vmul.f32 %v791_v16, %v785_v14 }
 0x15a   : > { %v779_v18 = vadd.f32 %v778_v15, %v760_v63  ;;  %v794_v27 = vadd.f32 %v793_v23, %v792_v22 }
 0x15c   : > { %v786_v20 = vadd.f32 %v779_v18, %v1889_v19 }
 0x15e   : > { %v787_v24 = vsel %vm784_vm8, %v786_v20, %v779_v18 }
 0x15f   : > { %v788_v25 = vsub.f32 %v1353_v21, %v787_v24 }
 0x161   : > { %v789_v26 = vmul.f32 0.5, %v788_v25 }
 0x163   : > { %v790_v28 = vadd.f32 70.0, %v789_v26 }
 0x165   : > { %v795_v29 = vadd.f32 %v794_v27, %v790_v28 }
 0x167   : > { %v796_v30 = vadd.f32 %v795_v29, %v785_v14 }
 0x169   : > { %v797_v31 = vmul.f32 0.02, %v796_v30  ;;  %v799_v32 = vmul.f32 2.5, %v796_v30 }
 0x16b   : > { %v798_v33 = vmul.f32 %v797_v31, %v796_v30 }
 0x16d   : > { %v800_v34 = vadd.f32 %v799_v32, %v798_v33 }
 0x16f   : > { %v801_v35 = vadd.f32 %v800_v34, %v790_v28  ;;  %v1359_v28 = vld [vmem:[%s1865_s9 + $0x58] sm:$0xff] }
 0x171   : > { %v802_v36 = vadd.f32 %v801_v35, %v796_v30 }
 0x173   : > { %v803_v37 = vmul.f32 0.2, %v802_v36  ;;  %1354 = vst [vmem:[%s1896_s17 + $0x40] sm:$0xff] %v802_v36  ;;  %vm811_vm9 = vcmp.ge.f32.partialorder %v802_v36, 30.0 }
 0x174   : > { %v812_v39 = vsel %vm811_vm9, %v1887_v17, %v802_v36 }
 0x175   : > { %v804_v38 = vsub.f32 %v803_v37, %v787_v24  ;;  %v818_v41 = vmul.f32 0.02, %v812_v39  ;;  %v820_v46 = vmul.f32 2.5, %v812_v39 }
 0x177   : > { %v805_v40 = vmul.f32 0.02, %v804_v38  ;;  %v819_v45 = vmul.f32 %v818_v41, %v812_v39 }
 0x179   : > { %v806_v42 = vadd.f32 %v805_v40, %v787_v24  ;;  %v821_v50 = vadd.f32 %v820_v46, %v819_v45 }
 0x17b   : > { %v813_v43 = vadd.f32 %v806_v42, %v1889_v19 }
 0x17d   : > { %v814_v47 = vsel %vm811_vm9, %v813_v43, %v806_v42 }
 0x17e   : > { %v815_v48 = vsub.f32 %v1355_v44, %v814_v47 }
 0x180   : > { %v816_v49 = vmul.f32 0.5, %v815_v48 }
 0x182   : > { %v817_v51 = vadd.f32 70.0, %v816_v49 }
 0x184   : > { %v822_v52 = vadd.f32 %v821_v50, %v817_v51 }
 0x186   : > { %v823_v53 = vadd.f32 %v822_v52, %v812_v39 }
 0x188   : > { %v824_v54 = vmul.f32 0.02, %v823_v53  ;;  %v826_v55 = vmul.f32 2.5, %v823_v53 }
 0x18a   : > { %v825_v56 = vmul.f32 %v824_v54, %v823_v53 }
 0x18c   : > { %v827_v57 = vadd.f32 %v826_v55, %v825_v56 }
 0x18e   : > { %v828_v58 = vadd.f32 %v827_v57, %v817_v51  ;;  %v1361_v51 = vld [vmem:[%s1865_s9 + $0x60] sm:$0xff] }
 0x190   : > { %v829_v59 = vadd.f32 %v828_v58, %v823_v53 }
 0x192   : > { %v830_v60 = vmul.f32 0.2, %v829_v59  ;;  %1356 = vst [vmem:[%s1896_s17 + $0x48] sm:$0xff] %v829_v59  ;;  %vm838_vm10 = vcmp.ge.f32.partialorder %v829_v59, 30.0 }
 0x193   : > { %v839_v62 = vsel %vm838_vm10, %v1887_v17, %v829_v59 }
 0x194   : > { %v831_v61 = vsub.f32 %v830_v60, %v814_v47  ;;  %v845_v0 = vmul.f32 0.02, %v839_v62  ;;  %v847_v5 = vmul.f32 2.5, %v839_v62 }
 0x196   : > { %v832_v63 = vmul.f32 0.02, %v831_v61  ;;  %v846_v4 = vmul.f32 %v845_v0, %v839_v62 }
 0x198   : > { %v833_v1 = vadd.f32 %v832_v63, %v814_v47  ;;  %v848_v9 = vadd.f32 %v847_v5, %v846_v4 }
 0x19a   : > { %v840_v2 = vadd.f32 %v833_v1, %v1889_v19 }
 0x19c   : > { %v841_v6 = vsel %vm838_vm10, %v840_v2, %v833_v1 }
 0x19d   : > { %v842_v7 = vsub.f32 %v1357_v3, %v841_v6 }
 0x19f   : > { %v843_v8 = vmul.f32 0.5, %v842_v7 }
 0x1a1   : > { %v844_v10 = vadd.f32 70.0, %v843_v8 }
 0x1a3   : > { %v849_v11 = vadd.f32 %v848_v9, %v844_v10 }
 0x1a5   : > { %v850_v12 = vadd.f32 %v849_v11, %v839_v62 }
 0x1a7   : > { %v851_v13 = vmul.f32 0.02, %v850_v12  ;;  %v853_v14 = vmul.f32 2.5, %v850_v12 }
 0x1a9   : > { %v852_v15 = vmul.f32 %v851_v13, %v850_v12 }
 0x1ab   : > { %v854_v16 = vadd.f32 %v853_v14, %v852_v15 }
 0x1ad   : > { %v855_v18 = vadd.f32 %v854_v16, %v844_v10  ;;  %v1363_v10 = vld [vmem:[%s1865_s9 + $0x68] sm:$0xff] }
 0x1af   : > { %v856_v20 = vadd.f32 %v855_v18, %v850_v12 }
 0x1b1   : > { %v857_v21 = vmul.f32 0.2, %v856_v20  ;;  %1358 = vst [vmem:[%s1896_s17 + $0x50] sm:$0xff] %v856_v20  ;;  %vm865_vm11 = vcmp.ge.f32.partialorder %v856_v20, 30.0 }
 0x1b2   : > { %v866_v23 = vsel %vm865_vm11, %v1887_v17, %v856_v20 }
 0x1b3   : > { %v858_v22 = vsub.f32 %v857_v21, %v841_v6  ;;  %v872_v25 = vmul.f32 0.02, %v866_v23  ;;  %v874_v30 = vmul.f32 2.5, %v866_v23 }
 0x1b5   : > { %v859_v24 = vmul.f32 0.02, %v858_v22  ;;  %v873_v29 = vmul.f32 %v872_v25, %v866_v23 }
 0x1b7   : > { %v860_v26 = vadd.f32 %v859_v24, %v841_v6  ;;  %v875_v34 = vadd.f32 %v874_v30, %v873_v29 }
 0x1b9   : > { %v867_v27 = vadd.f32 %v860_v26, %v1889_v19 }
 0x1bb   : > { %v868_v31 = vsel %vm865_vm11, %v867_v27, %v860_v26 }
 0x1bc   : > { %v869_v32 = vsub.f32 %v1359_v28, %v868_v31 }
 0x1be   : > { %v870_v33 = vmul.f32 0.5, %v869_v32 }
 0x1c0   : > { %v871_v35 = vadd.f32 70.0, %v870_v33 }
 0x1c2   : > { %v876_v36 = vadd.f32 %v875_v34, %v871_v35 }
 0x1c4   : > { %v877_v37 = vadd.f32 %v876_v36, %v866_v23 }
 0x1c6   : > { %v878_v38 = vmul.f32 0.02, %v877_v37  ;;  %v880_v39 = vmul.f32 2.5, %v877_v37 }
 0x1c8   : > { %v879_v40 = vmul.f32 %v878_v38, %v877_v37 }
 0x1ca   : > { %v881_v41 = vadd.f32 %v880_v39, %v879_v40 }
 0x1cc   : > { %v882_v42 = vadd.f32 %v881_v41, %v871_v35  ;;  %v1365_v35 = vld [vmem:[%s1865_s9 + $0x70] sm:$0xff] }
 0x1ce   : > { %v883_v43 = vadd.f32 %v882_v42, %v877_v37 }
 0x1d0   : > { %v884_v44 = vmul.f32 0.2, %v883_v43  ;;  %1360 = vst [vmem:[%s1896_s17 + $0x58] sm:$0xff] %v883_v43  ;;  %vm892_vm12 = vcmp.ge.f32.partialorder %v883_v43, 30.0 }
 0x1d1   : > { %v893_v46 = vsel %vm892_vm12, %v1887_v17, %v883_v43 }
 0x1d2   : > { %v885_v45 = vsub.f32 %v884_v44, %v868_v31  ;;  %v899_v48 = vmul.f32 0.02, %v893_v46  ;;  %v901_v53 = vmul.f32 2.5, %v893_v46 }
 0x1d4   : > { %v886_v47 = vmul.f32 0.02, %v885_v45  ;;  %v900_v52 = vmul.f32 %v899_v48, %v893_v46 }
 0x1d6   : > { %v887_v49 = vadd.f32 %v886_v47, %v868_v31  ;;  %v902_v57 = vadd.f32 %v901_v53, %v900_v52  ;;  %v1684_v52 = vmov 0.0  }
 0x1d8   : > { %v894_v50 = vadd.f32 %v887_v49, %v1889_v19 }
 0x1da   : > { %v895_v54 = vsel %vm892_vm12, %v894_v50, %v887_v49 }
 0x1db   : > { %v896_v55 = vsub.f32 %v1361_v51, %v895_v54 }
 0x1dd   : > { %v897_v56 = vmul.f32 0.5, %v896_v55 }
 0x1df   : > { %v898_v58 = vadd.f32 70.0, %v897_v56 }
 0x1e1   : > { %v903_v59 = vadd.f32 %v902_v57, %v898_v58 }
 0x1e3   : > { %v904_v60 = vadd.f32 %v903_v59, %v893_v46  ;;  %v1367_v59 = vld [vmem:[%s1865_s9 + $0x78] sm:$0xff]  ;;  %s524_s9 = scalar_lea.vmem [#allocation8], %s1861_s13 }
 0x1e4   : > { %s1035_s15 = sshll.u32 %s524_s9, 4  ;;  %s1981_s15 = int_to_ptr.vmem [resolvable:$true] %s1035_s15 }
 0x1e5   : > { %v905_v61 = vmul.f32 0.02, %v904_v60  ;;  %v907_v62 = vmul.f32 2.5, %v904_v60  ;;  %s1510_s14 = scalar_lea.vmem %s1981_s15, 128  ;;  %p1517_p10 = scmp.lt.s32.totalorder %s1981_s15, %s1515_s19 }
 0x1e6   : > { %p1511_p8 = scmp.ne.s32.totalorder %s1981_s15, %s1510_s14  ;;  %p1518_p13 = scmp.lt.s32.totalorder %s1516_s20, %s1510_s14 }
 0x1e7   : > { %v906_v63 = vmul.f32 %v905_v61, %v904_v60 }
 0x1e8   : > { %p1512_p12 = pnand %p1511_p8, %p1792_p9  ;;  %p1519_p0 = por %p1518_p13, %p1517_p10 }
 0x1e9   : > { %v908_v0 = vadd.f32 %v907_v62, %v906_v63 }
 0x1ea   : > { %p1513_p7 = pneg %p1512_p12 }
 0x1eb   : > { %v909_v1 = vadd.f32 %v908_v0, %v898_v58 }
 0x1ec   : > { %p1520_p1 = pnand %p1519_p0, %p1513_p7 }
 0x1ed   : > { %v910_v2 = vadd.f32 %v909_v1, %v904_v60 }
 0x1ef   : > { %v911_v3 = vmul.f32 0.2, %v910_v2  ;;  %1362 = vst [vmem:[%s1896_s17 + $0x60] sm:$0xff] %v910_v2  ;;  %vm919_vm13 = vcmp.ge.f32.partialorder %v910_v2, 30.0 }
 0x1f0   : > { %v920_v5 = vsel %vm919_vm13, %v1887_v17, %v910_v2 }
 0x1f1   : > { %v912_v4 = vsub.f32 %v911_v3, %v895_v54  ;;  %v926_v7 = vmul.f32 0.02, %v920_v5  ;;  %v928_v12 = vmul.f32 2.5, %v920_v5 }
 0x1f3   : > { %v913_v6 = vmul.f32 0.02, %v912_v4  ;;  %v927_v11 = vmul.f32 %v926_v7, %v920_v5 }
 0x1f5   : > { %v914_v8 = vadd.f32 %v913_v6, %v895_v54  ;;  %v929_v16 = vadd.f32 %v928_v12, %v927_v11 }
 0x1f7   : > { %v921_v9 = vadd.f32 %v914_v8, %v1889_v19 }
 0x1f9   : > { %v922_v13 = vsel %vm919_vm13, %v921_v9, %v914_v8 }
 0x1fa   : > { %v923_v14 = vsub.f32 %v1363_v10, %v922_v13 }
 0x1fc   : > { %v924_v15 = vmul.f32 0.5, %v923_v14 }
 0x1fe   : > { %v925_v18 = vadd.f32 70.0, %v924_v15 }
 0x200   : > { %v930_v20 = vadd.f32 %v929_v16, %v925_v18 }
 0x202   : > { %v931_v21 = vadd.f32 %v930_v20, %v920_v5 }
 0x204   : > { %v932_v22 = vmul.f32 0.02, %v931_v21  ;;  %v934_v23 = vmul.f32 2.5, %v931_v21 }
 0x206   : > { %v933_v24 = vmul.f32 %v932_v22, %v931_v21 }
 0x208   : > { %v935_v25 = vadd.f32 %v934_v23, %v933_v24 }
 0x20a   : > { %v936_v26 = vadd.f32 %v935_v25, %v925_v18 }
 0x20c   : > { %v937_v27 = vadd.f32 %v936_v26, %v931_v21 }
 0x20e   : > { %v938_v28 = vmul.f32 0.2, %v937_v27  ;;  %1364 = vst [vmem:[%s1896_s17 + $0x68] sm:$0xff] %v937_v27  ;;  %vm946_vm14 = vcmp.ge.f32.partialorder %v937_v27, 30.0 }
 0x20f   : > { %v947_v30 = vsel %vm946_vm14, %v1887_v17, %v937_v27 }
 0x210   : > { %v939_v29 = vsub.f32 %v938_v28, %v922_v13  ;;  %v953_v32 = vmul.f32 0.02, %v947_v30  ;;  %v955_v37 = vmul.f32 2.5, %v947_v30 }
 0x212   : > { %v940_v31 = vmul.f32 0.02, %v939_v29  ;;  %v954_v36 = vmul.f32 %v953_v32, %v947_v30 }
 0x214   : > { %v941_v33 = vadd.f32 %v940_v31, %v922_v13  ;;  %v956_v41 = vadd.f32 %v955_v37, %v954_v36 }
 0x216   : > { %v948_v34 = vadd.f32 %v941_v33, %v1889_v19 }
 0x218   : > { %v949_v38 = vsel %vm946_vm14, %v948_v34, %v941_v33 }
 0x219   : > { %v950_v39 = vsub.f32 %v1365_v35, %v949_v38 }
 0x21b   : > { %v951_v40 = vmul.f32 0.5, %v950_v39 }
 0x21d   : > { %v952_v42 = vadd.f32 70.0, %v951_v40 }
 0x21f   : > { %v957_v43 = vadd.f32 %v956_v41, %v952_v42 }
 0x221   : > { %v958_v44 = vadd.f32 %v957_v43, %v947_v30 }
 0x223   : > { %v959_v45 = vmul.f32 0.02, %v958_v44  ;;  %v961_v46 = vmul.f32 2.5, %v958_v44 }
 0x225   : > { %v960_v47 = vmul.f32 %v959_v45, %v958_v44 }
 0x227   : > { %v962_v48 = vadd.f32 %v961_v46, %v960_v47 }
 0x229   : > { %v963_v49 = vadd.f32 %v962_v48, %v952_v42 }
 0x22b   : > { %v964_v50 = vadd.f32 %v963_v49, %v958_v44 }
 0x22d   : > { %1366 = vst [vmem:[%s1896_s17 + $0x70] sm:$0xff] %v964_v50  ;;  %v965_v51 = vmul.f32 0.2, %v964_v50  ;;  %vm973_vm15 = vcmp.ge.f32.partialorder %v964_v50, 30.0 }
 0x22e   : > { %v1369_v53 = vsel %vm973_vm15, 1.0, %v1684_v52  ;;  %v974_v55 = vsel %vm973_vm15, %v1887_v17, %v964_v50 }
 0x22f   : > { %v966_v54 = vsub.f32 %v965_v51, %v949_v38  ;;  %1005 = vst [vmem:[%s538_s26] sm:$0xff] %v1369_v53  ;;  %v980_v57 = vmul.f32 0.02, %v974_v55  ;;  %v982_v62 = vmul.f32 2.5, %v974_v55 }
 0x231   : > { %v967_v56 = vmul.f32 0.02, %v966_v54  ;;  %v981_v61 = vmul.f32 %v980_v57, %v974_v55 }
 0x233   : > { %v968_v58 = vadd.f32 %v967_v56, %v949_v38  ;;  %v983_v17 = vadd.f32 %v982_v62, %v981_v61 }
 0x235   : > { %v975_v60 = vadd.f32 %v968_v58, %v1889_v19 }
 0x237   : > { %v1961_v63 = vsel %vm973_vm15, %v975_v60, %v968_v58 }
 0x238   : > { %v977_v0 = vsub.f32 %v1367_v59, %v1961_v63 }
 0x23a   : > { %v978_v1 = vmul.f32 0.5, %v977_v0 }
 0x23c   : > { %v979_v2 = vadd.f32 70.0, %v978_v1 }
 0x23e   : > { %v984_v3 = vadd.f32 %v983_v17, %v979_v2 }
 0x240   : > { %v985_v4 = vadd.f32 %v984_v3, %v974_v55 }
 0x242   : > { %v986_v5 = vmul.f32 0.02, %v985_v4  ;;  %v988_v6 = vmul.f32 2.5, %v985_v4 }
 0x244   : > { %v987_v7 = vmul.f32 %v986_v5, %v985_v4 }
 0x246   : > { %v989_v19 = vadd.f32 %v988_v6, %v987_v7 }
 0x248   : > { %v990_v8 = vadd.f32 %v989_v19, %v979_v2 }
 0x24a   : > { %v991_v9 = vadd.f32 %v990_v8, %v985_v4 }
 0x24c   : > { %v992_v10 = vmul.f32 0.2, %v991_v9  ;;  %1368 = vst [vmem:[%s1896_s17 + $0x78] sm:$0xff] %v991_v9  ;;  %998 = vst [vmem:[%s524_s9] sm:$0xff] %v991_v9 }
 0x24d   : > { %1523 = shalt.err (!%p1520_p1)
}
 0x24e   : > { %s1524_s17 = scalar_lea.hbm %s1979_s23, 128  ;;  %s1528_s25 = scalar_lea.hbm %s2128_s5, 256 }
 0x24f   : > { %p1525_p2 = scmp.ne.s32.totalorder %s1979_s23, %s1524_s17  ;;  %p1529_p6 = scmp.lt.s32.totalorder %s1979_s23, %s2128_s5 }
 0x250   : > { %p1530_p4 = scmp.lt.s32.totalorder %s1528_s25, %s1524_s17 }
 0x251   : > { %p1526_p3 = pnand %p1525_p2, %p1792_p9 }
 0x252   : > { %p1531_p8 = por %p1530_p4, %p1529_p6 }
 0x253   : > { %p1527_p5 = pneg %p1526_p3 }
 0x255   : > { %p1532_p12 = pnand %p1531_p8, %p1527_p5 }
 0x257   : > { %1535 = shalt.err (!%p1532_p12)
}
 0x258   : > { %1384 = dma.vmem_to_hbm [thread:$0]  (%p1792_p9), %s1981_s15, 128, %s1979_s23, %s1007_s24   ;;  %v993_v11 = vsub.f32 %v992_v10, %v1961_v63 }
 0x259   : > { %s1022_s14 = scalar_lea.sflag [#allocation13], %s1857_s0  ;;  %s1536_s19 = scalar_lea.vmem %s1983_s22, 2048 }
 0x25a   : > { %p1537_p7 = scmp.ne.s32.totalorder %s1983_s22, %s1536_s19  ;;  %s1686_s20 = smov [#allocation12]  }
 0x25b   : > { %s1540_s17 = sshll.u32 %s1686_s20, 4  ;;  %s1541_s17 = int_to_ptr.vmem [resolvable:$false] %s1540_s17 }
 0x25c   : > { %p1538_p10 = pnand %p1537_p7, %p1792_p9  ;;  %s1542_s9 = scalar_lea.vmem %s1541_s17, 4096 }
 0x25d   : > { %p1543_p0 = scmp.lt.s32.totalorder %s1983_s22, %s1541_s17  ;;  %p1544_p1 = scmp.lt.s32.totalorder %s1542_s9, %s1536_s19 }
 0x25e   : > { %p1539_p13 = pneg %p1538_p10 }
 0x25f   : > { %p1545_p2 = por %p1544_p1, %p1543_p0 }
 0x261   : > { %p1546_p3 = pnand %p1545_p2, %p1539_p13 }
 0x263   : > { %1549 = shalt.err (!%p1546_p3)
}
 0x264   : > { %s1550_s15 = scalar_lea.hbm %s1972_s21, 2048  ;;  %s1554_s16 = scalar_lea.hbm %s2131_s8, 4096 }
 0x265   : > { %p1551_p5 = scmp.ne.s32.totalorder %s1972_s21, %s1550_s15  ;;  %p1555_p8 = scmp.lt.s32.totalorder %s1972_s21, %s2131_s8 }
 0x266   : > { %p1556_p12 = scmp.lt.s32.totalorder %s1554_s16, %s1550_s15 }
 0x267   : > { %p1552_p6 = pnand %p1551_p5, %p1792_p9 }
 0x268   : > { %p1557_p7 = por %p1556_p12, %p1555_p8 }
 0x269   : > { %p1553_p4 = pneg %p1552_p6 }
 0x26b   : > { %p1558_p10 = pnand %p1557_p7, %p1553_p4 }
 0x26d   : > { %1561 = shalt.err (!%p1558_p10)
}
 0x26e   : > { %s1687_s29 = smov 128   ;;  %s1688_s19 = smov 256   ;;  %v994_v12 = vmul.f32 0.02, %v993_v11 }
 0x26f   : > { %s1689_s20 = smov 8   ;;  %s531_s17 = scalar_lea.vmem [#allocation9], %s1861_s13 }
 0x270   : > { %1387 = dma.vmem_to_hbm [thread:$0]  (%p1792_p9), %s1983_s22, 2048, %s1972_s21, %s1022_s14, %s1687_s29, %s1688_s19, %s1689_s20   ;;  %v995_v13 = vadd.f32 %v994_v12, %v1961_v63 }
 0x271   : > { %s1048_s9 = sshll.u32 %s531_s17, 4  ;;  %s1061_s15 = sshll.u32 %s538_s26, 4  ;;  %s2042_s9 = int_to_ptr.vmem [resolvable:$true] %s1048_s9  ;;  %s2044_s15 = int_to_ptr.vmem [resolvable:$true] %s1061_s15 }
 0x272   : > { %s2040_s16 = scalar_lea.hbm %s2129_s6, %s1965_s3  ;;  %s2050_s13 = scalar_lea.hbm %s2130_s7, %s1965_s3  ;;  %999 = vst [vmem:[%s531_s17] sm:$0xff] %v995_v13 }
 0x273   : > { %s2054_s26 = scalar_lea.sflag [#allocation10], %s1011_s30  ;;  %s1562_s22 = scalar_lea.vmem %s2042_s9, 128 }
 0x274   : > { %p1563_p13 = scmp.ne.s32.totalorder %s2042_s9, %s1562_s22  ;;  %s1690_s14 = smov [#allocation9]  }
 0x275   : > { %s1566_s25 = sshll.u32 %s1690_s14, 4  ;;  %s1567_s25 = int_to_ptr.vmem [resolvable:$false] %s1566_s25 }
 0x276   : > { %p1564_p0 = pnand %p1563_p13, %p1792_p9  ;;  %s1568_s12 = scalar_lea.vmem %s1567_s25, 256 }
 0x277   : > { %p1569_p2 = scmp.lt.s32.totalorder %s2042_s9, %s1567_s25  ;;  %p1570_p3 = scmp.lt.s32.totalorder %s1568_s12, %s1562_s22 }
 0x278   : > { %p1565_p1 = pneg %p1564_p0 }
 0x279   : > { %p1571_p5 = por %p1570_p3, %p1569_p2 }
 0x27b   : > { %p1572_p6 = pnand %p1571_p5, %p1565_p1 }
 0x27d   : > { %1575 = shalt.err (!%p1572_p6)
}
 0x27e   : > { %s1576_s11 = scalar_lea.hbm %s2040_s16, 128  ;;  %s1580_s29 = scalar_lea.hbm %s2129_s6, 256 }
 0x27f   : > { %p1577_p4 = scmp.ne.s32.totalorder %s2040_s16, %s1576_s11  ;;  %p1581_p7 = scmp.lt.s32.totalorder %s2040_s16, %s2129_s6 }
 0x280   : > { %p1582_p10 = scmp.lt.s32.totalorder %s1580_s29, %s1576_s11 }
 0x281   : > { %p1578_p8 = pnand %p1577_p4, %p1792_p9 }
 0x282   : > { %p1583_p13 = por %p1582_p10, %p1581_p7 }
 0x283   : > { %p1579_p12 = pneg %p1578_p8 }
 0x285   : > { %p1584_p0 = pnand %p1583_p13, %p1579_p12 }
 0x287   : > { %1587 = shalt.err (!%p1584_p0)
}
 0x288   : > { %1385 = dma.vmem_to_hbm [thread:$0]  (%p1792_p9), %s2042_s9, 128, %s2040_s16, %s2054_s26  }
 0x289   : > { %s1588_s17 = scalar_lea.vmem %s2044_s15, 128  ;;  %s1691_s23 = smov [#allocation11]  }
 0x28a   : > { %p1589_p1 = scmp.ne.s32.totalorder %s2044_s15, %s1588_s17  ;;  %s1592_s24 = sshll.u32 %s1691_s23, 4  ;;  %s1593_s24 = int_to_ptr.vmem [resolvable:$false] %s1592_s24 }
 0x28b   : > { %s1594_s0 = scalar_lea.vmem %s1593_s24, 256  ;;  %p1595_p5 = scmp.lt.s32.totalorder %s2044_s15, %s1593_s24 }
 0x28c   : > { %p1590_p2 = pnand %p1589_p1, %p1792_p9  ;;  %p1596_p6 = scmp.lt.s32.totalorder %s1594_s0, %s1588_s17 }
 0x28e   : > { %p1591_p3 = pneg %p1590_p2  ;;  %p1597_p4 = por %p1596_p6, %p1595_p5 }
 0x290   : > { %p1598_p8 = pnand %p1597_p4, %p1591_p3 }
 0x292   : > { %1601 = shalt.err (!%p1598_p8)
}
 0x293   : > { %s1602_s21 = scalar_lea.hbm %s2050_s13, 128  ;;  %s1606_s22 = scalar_lea.hbm %s2130_s7, 256 }
 0x294   : > { %p1603_p12 = scmp.ne.s32.totalorder %s2050_s13, %s1602_s21  ;;  %p1607_p13 = scmp.lt.s32.totalorder %s2050_s13, %s2130_s7 }
 0x295   : > { %p1608_p0 = scmp.lt.s32.totalorder %s1606_s22, %s1602_s21 }
 0x296   : > { %p1604_p7 = pnand %p1603_p12, %p1792_p9 }
 0x297   : > { %p1609_p1 = por %p1608_p0, %p1607_p13 }
 0x298   : > { %p1605_p10 = pneg %p1604_p7 }
 0x29a   : > { %p1610_p2 = pnand %p1609_p1, %p1605_p10 }
 0x29c   : > { %1613 = shalt.err (!%p1610_p2)
}
 0x29d   : > { %1386 = dma.vmem_to_hbm [thread:$0]  (%p1792_p9), %s2044_s15, 128, %s2050_s13, %s2054_s26  }
 0x29e PF: > { %s1091_s11 = sand.u32 1, %s1660_s27   ;;  %p2152_p3 = scmp.ge.s32.totalorder %s1680_s10, 2 }
 0x29f   : > { %s1092_s3 = scalar_lea.sflag [#allocation5], %s1091_s11 }
 0x2a0   : > { %p1393_p5 = pnand %p2152_p3, %p1801_p11 }
 0x2a2   : > { %p1394_p6 = pneg %p1393_p5 }
 0x2a4   : > { %1647 = dma.done.wait (%p1394_p6), %s1092_s3, 128  }
 0x2a5   : > { %1649 = vsyncadd (%p1394_p6), %s1092_s3, 4294967168  ;;  %s2153_s30 = sadd.s32 4294967294, %s1680_s10  }
 0x2a6   : > { %s1100_s29 = sand.u32 1, %s2153_s30  }
 0x2a7   : > { %s1101_s18 = scalar_lea.sflag [#allocation10], %s1100_s29 }
 0x2a8   : > { %1651 = dma.done.wait (%p1394_p6), %s1101_s18, 256  }
 0x2a9   : > { %1653 = vsyncadd (%p1394_p6), %s1101_s18, 4294967040  ;;  %s1119_s19 = scalar_lea.sflag [#allocation13], %s1091_s11 }
 0x2aa   : > { %1655 = dma.done.wait (%p1394_p6), %s1119_s19, 2048  }
 0x2ab   : > { %1657 = vsyncadd (%p1394_p6), %s1119_s19, 4294965248  ;;  %s34_s10 = sadd.s32 1, %s1680_s10   ;;  %s2154_s15 = sld [smem:[#allocation19_spill]] }
 0x2ac   : > { %p31_p9 = scmp.ge.s32.totalorder %s34_s10, 4   ;;  %s2155_s29 = sld [smem:[#allocation22_spill]] }
 0x2ad   : > { %s2156_s30 = sld [smem:[#allocation20_spill]]  ;;  %s2158_s27 = smov %s1664_s28 }
 0x2ae   : > { %s2157_s9 = sld [smem:[#allocation21_spill]]  ;;  %33 = sbr.rel (!%p31_p9) target bundleno = 15 (0xf), region = 237 }
 0x2b1   : > { %s2159_s28 = smov %s2154_s15 }
 0x2b3   :  { %1124 = vsyncpa [#allocation4], 1 }
 0x2b4   :  { %1126 = vsyncpa [#allocation4 + $0x1], 1 }
 0x2b5   :  { %1127 = vsyncpa [#allocation7], 1 }
 0x2b6   :  { %1129 = vsyncpa [#allocation7 + $0x1], 1 }
 0x2b7   :  { %1130 = vsyncpa [#allocation5], 1 }
 0x2b8   :  { %1132 = vsyncpa [#allocation5 + $0x1], 1 }
 0x2b9   :  { %1133 = vsyncpa [#allocation10], 1 }
 0x2ba   :  { %1135 = vsyncpa [#allocation10 + $0x1], 1 }
 0x2bb   :  { %1136 = vsyncpa [#allocation13], 1 }
 0x2bc   :  { %1138 = vsyncpa [#allocation13 + $0x1], 1 }

</bundles_post_ra>
